<compile_context>
chip_gen: v5e
topology: v5e:2x2
jax: 0.10.0
libtpu: 0.0.40
codegen_flags: <defaults>
</compile_context>

<pallas_src>
import math

import jax
import jax.numpy as jnp
from jax.experimental import pallas as pl
from jax.experimental.pallas import tpu as pltpu

# ----------------------- model hyper-parameters (small) ----------------------
VOCAB = 50
WORD_EMB_DIM = 32
ENCODER_DIM = 32           # args.encoder_dim
ASP_LABEL_SIZE = 5         # data.asp_label_alphabet.size()
ASP_LABEL_DIM = 8          # args.asp_label_dim
OPI_LABEL_SIZE = 4         # data.opi_label_alphabet.size()
POLAR_SIZE = 4             # data.polar_alphabet.size()
OPINION_INPUT_DIM = 32     # args.opinion_input_dim
OPINION_FUSION_DIM = 300   # hard-coded in the module
HEAD_DIM = 16              # args.head_dim
NUM_HEAD = 2               # args.num_head

# Column layout of the lane-aligned "small" projection slab (exactly one vreg).
NONKEY_OFF = 0
KEYENC_OFF = NONKEY_OFF + OPINION_INPUT_DIM            # 32
ATTNK_OFF = KEYENC_OFF + OPINION_INPUT_DIM             # 64
ATTNV_OFF = ATTNK_OFF + NUM_HEAD * HEAD_DIM            # 96
SMALL4_DIM = ATTNV_OFF + NUM_HEAD * HEAD_DIM           # 128
BIG_DIM = SMALL4_DIM + OPINION_FUSION_DIM              # 428 (small4 | opi_lin)


def _row_tile(n):
    """Biggest row tile that divides n (kernel-1 token-parallel grid)."""
    for t in (1024, 512, 256, 128, 64, 32, 16, 8):
        if n % t == 0:
            return t
    return n


# ------------------------------ Pallas kernels -------------------------------

def _encode_project_kernel(x_ref, ew_ref, eb_ref, wbig_ref, bbig_ref,
                           wasp_ref, basp_ref, asp_ref, small4_ref, opi_ref):
    # TODO(synk): WordHiddenRep is presumably a (Bi)LSTM; approximated by a
    # per-token linear + tanh (shape-consistent stand-in).
    h = jnp.tanh(jnp.dot(x_ref[...], ew_ref[...],
                         preferred_element_type=jnp.float32) + eb_ref[...])
    hb = h.astype(jnp.bfloat16)
    big = jnp.dot(hb, wbig_ref[...],
                  preferred_element_type=jnp.float32) + bbig_ref[...]
    small4_ref[...] = big[:, :SMALL4_DIM]                  # vreg-aligned slice
    opi_ref[...] = big[:, SMALL4_DIM:BIG_DIM]              # starts on a vreg boundary
    asp_ref[...] = jnp.dot(hb, wasp_ref[...],
                           preferred_element_type=jnp.float32) + basp_ref[...]


def encode_and_project(x_bf16, fused):
    """x: (N, E) bf16 -> (asp_out (N,5), small4 (N,128), opi_proj (N,300)) f32."""
    n, din = x_bf16.shape
    tm = _row_tile(n)
    return pl.pallas_call(
        _encode_project_kernel,
        out_shape=(jax.ShapeDtypeStruct((n, ASP_LABEL_SIZE), jnp.float32),
                   jax.ShapeDtypeStruct((n, SMALL4_DIM), jnp.float32),
                   jax.ShapeDtypeStruct((n, OPINION_FUSION_DIM), jnp.float32)),
        grid=(n // tm,),
        in_specs=[pl.BlockSpec((tm, din), lambda i: (i, 0)),
                  pl.BlockSpec(fused["enc_w"].shape, lambda i: (0, 0)),
                  pl.BlockSpec(fused["enc_b"].shape, lambda i: (0, 0)),
                  pl.BlockSpec(fused["w_big"].shape, lambda i: (0, 0)),
                  pl.BlockSpec(fused["b_big"].shape, lambda i: (0, 0)),
                  pl.BlockSpec(fused["w_asp"].shape, lambda i: (0, 0)),
                  pl.BlockSpec(fused["b_asp"].shape, lambda i: (0, 0))],
        out_specs=(pl.BlockSpec((tm, ASP_LABEL_SIZE), lambda i: (i, 0)),
                   pl.BlockSpec((tm, SMALL4_DIM), lambda i: (i, 0)),
                   pl.BlockSpec((tm, OPINION_FUSION_DIM), lambda i: (i, 0))),
        compiler_params=pltpu.CompilerParams(dimension_semantics=("parallel",)),
    )(x_bf16, fused["enc_w"], fused["enc_b"], fused["w_big"], fused["b_big"],
      fused["w_asp"], fused["b_asp"])


def _fused_opinion_kernel(fmask_ref, tagb_ref, small4_ref, opiproj_ref, pmask_ref,
                          w_opi_ref, b_opi_ref, wq_key_ref, wq_opi_ref, qb_ref,
                          wc_key_ref, wc_opi_ref, wc_ctx_ref, cb_ref,
                          opi_logits_ref, opi_tags_ref, probs_ref, preds_ref):
    s = fmask_ref.shape[1]
    small4 = small4_ref[0]                                            # (S, 128)
    nonkey = small4[:, NONKEY_OFF:NONKEY_OFF + OPINION_INPUT_DIM]
    key_enc = small4[:, KEYENC_OFF:KEYENC_OFF + OPINION_INPUT_DIM]
    attn_k = small4[:, ATTNK_OFF:ATTNK_OFF + NUM_HEAD * HEAD_DIM]
    attn_v = small4[:, ATTNV_OFF:ATTNV_OFF + NUM_HEAD * HEAD_DIM]

    # --- aspect feature fusion (fmask @ seq_out commutes with the bias-free
    #     key-encoder projection; embedding part + bias arrive as tag_bias). ---
    asp_key = jnp.dot(fmask_ref[0], key_enc,
                      preferred_element_type=jnp.float32) + tagb_ref[0]   # (S,32)

    # --- pairwise opinion logits: single (S*S,32)@(32,4) MXU pass. ---
    pair = jnp.maximum(asp_key[:, None, :] + nonkey[None, :, :], 0.0)     # (S,S,32)
    pair2 = pair.reshape(s * s, OPINION_INPUT_DIM).astype(jnp.bfloat16)
    logits_flat = jnp.dot(pair2, w_opi_ref[...],
                          preferred_element_type=jnp.float32) + b_opi_ref[...]
    logits3 = logits_flat.reshape(s, s, OPI_LABEL_SIZE)                   # (S,S,4)
    opi_logits_ref[0] = logits3

    # --- fused 4-label argmax (first-max index like torch.max) + pair mask. ---
    lmax = jnp.max(logits3, axis=2, keepdims=True)
    lidx = jax.lax.broadcasted_iota(jnp.int32, logits3.shape, 2)
    tags = jnp.min(jnp.where(logits3 >= lmax, lidx, jnp.int32(OPI_LABEL_SIZE)),
                   axis=2)                                                # (S,S)
    tags = tags * pmask_ref[0]
    opi_tags_ref[0] = tags

    # --- opinion boundary mask built in-kernel (cummax via masked broadcast-max):
    #     tag==2 opens a span, tag>2 continues, tag<2 closes (exclusive); a span
    #     still open at the end only marks the last position. ---
    a_in = jax.lax.broadcasted_iota(jnp.int32, (s, s, s), 2)
    a_out = jax.lax.broadcasted_iota(jnp.int32, (s, s, s), 1)
    t_b = tags[:, None, :]                                                # (S,1,S)
    le = a_in <= a_out
    last_b = jnp.max(jnp.where(le & (t_b == 2), a_in, jnp.int32(-1)), axis=2)
    last_brk = jnp.max(jnp.where(le & (t_b < 2), a_in, jnp.int32(-1)), axis=2)
    alive = last_b > last_brk
    span_start = jnp.where(alive, last_b, jnp.int32(-2))
    open_end = alive[:, s - 1:s]
    end_start = span_start[:, s - 1:s]
    closed = alive & jnp.logical_not(open_end & (span_start == end_start))
    row_i = jax.lax.broadcasted_iota(jnp.int32, (s, s), 0)
    col_i = jax.lax.broadcasted_iota(jnp.int32, (s, s), 1)
    m = jnp.maximum((row_i == col_i).astype(jnp.float32),
                    closed.astype(jnp.float32))
    m = jnp.maximum(m, (open_end & (col_i == s - 1)).astype(jnp.float32))
    ofmask = m / jnp.sum(m, axis=1, keepdims=True)                        # rows sum to 1

    # --- opinion feature fusion (row-sum-1 mask -> opi_linear bias passes through). ---
    opi_feat = jnp.dot(ofmask, opiproj_ref[0],
                       preferred_element_type=jnp.float32)                # (S,300)

    # --- attention query + classification head (concat split into per-part dots). ---
    asp_key_b = asp_key.astype(jnp.bfloat16)
    opi_feat_b = opi_feat.astype(jnp.bfloat16)
    q = (jnp.dot(asp_key_b, wq_key_ref[...], preferred_element_type=jnp.float32)
         + jnp.dot(opi_feat_b, wq_opi_ref[...], preferred_element_type=jnp.float32)
         + qb_ref[...])                                                   # (S, 32)
    logits = (jnp.dot(asp_key_b, wc_key_ref[...], preferred_element_type=jnp.float32)
              + jnp.dot(opi_feat_b, wc_opi_ref[...], preferred_element_type=jnp.float32)
              + cb_ref[...])                                              # (S, 4)

    # TODO(synk): Attention module source not provided; standard scaled-dot MHA
    # assumed, no key-padding mask.  NUM_HEAD=2 static unroll (a head-batched
    # dot_general would unroll identically in Mosaic).
    wc_ctx = wc_ctx_ref[...]
    scale = 1.0 / math.sqrt(HEAD_DIM)
    for h in range(NUM_HEAD):
        lo = h * HEAD_DIM
        hi = lo + HEAD_DIM
        qh = q[:, lo:hi]
        kh = attn_k[:, lo:hi]
        vh = attn_v[:, lo:hi]
        sc = jax.lax.dot_general(qh, kh, (((1,), (1,)), ((), ())),
                                 preferred_element_type=jnp.float32) * scale
        sc = sc - jnp.max(sc, axis=1, keepdims=True)
        p = jnp.exp(sc)
        p = p / jnp.sum(p, axis=1, keepdims=True)
        ctx = jnp.dot(p, vh, preferred_element_type=jnp.float32)          # (S, hd)
        logits = logits + jnp.dot(ctx.astype(jnp.bfloat16), wc_ctx[lo:hi, :],
                                  preferred_element_type=jnp.float32)

    probs_ref[0] = logits
    pmax = jnp.max(logits, axis=1, keepdims=True)
    pidx = jax.lax.broadcasted_iota(jnp.int32, logits.shape, 1)
    preds_ref[0] = jnp.min(jnp.where(logits >= pmax, pidx, jnp.int32(POLAR_SIZE)),
                           axis=1, keepdims=True)                         # (S,1)


def fused_opinion_polarity(fmask, tag_bias, small4, opi_proj, pair_mask, fused):
    bsz, s, _ = fmask.shape
    return pl.pallas_call(
        _fused_opinion_kernel,
        out_shape=(jax.ShapeDtypeStruct((bsz, s, s, OPI_LABEL_SIZE), jnp.float32),
                   jax.ShapeDtypeStruct((bsz, s, s), jnp.int32),
                   jax.ShapeDtypeStruct((bsz, s, POLAR_SIZE), jnp.float32),
                   jax.ShapeDtypeStruct((bsz, s, 1), jnp.int32)),
        grid=(bsz,),
        in_specs=[pl.BlockSpec((1, s, s), lambda b: (b, 0, 0)),
                  pl.BlockSpec((1, s, OPINION_INPUT_DIM), lambda b: (b, 0, 0)),
                  pl.BlockSpec((1, s, SMALL4_DIM), lambda b: (b, 0, 0)),
                  pl.BlockSpec((1, s, OPINION_FUSION_DIM), lambda b: (b, 0, 0)),
                  pl.BlockSpec((1, s, s), lambda b: (b, 0, 0)),
                  pl.BlockSpec(fused["w_opi"].shape, lambda b: (0, 0)),
                  pl.BlockSpec(fused["b_opi"].shape, lambda b: (0, 0)),
                  pl.BlockSpec(fused["wq_key"].shape, lambda b: (0, 0)),
                  pl.BlockSpec(fused["wq_opi"].shape, lambda b: (0, 0)),
                  pl.BlockSpec(fused["q_b"].shape, lambda b: (0, 0)),
                  pl.BlockSpec(fused["wc_key"].shape, lambda b: (0, 0)),
                  pl.BlockSpec(fused["wc_opi"].shape, lambda b: (0, 0)),
                  pl.BlockSpec(fused["wc_ctx"].shape, lambda b: (0, 0)),
                  pl.BlockSpec(fused["cls_b"].shape, lambda b: (0, 0))],
        out_specs=(pl.BlockSpec((1, s, s, OPI_LABEL_SIZE), lambda b: (b, 0, 0, 0)),
                   pl.BlockSpec((1, s, s), lambda b: (b, 0, 0)),
                   pl.BlockSpec((1, s, POLAR_SIZE), lambda b: (b, 0, 0)),
                   pl.BlockSpec((1, s, 1), lambda b: (b, 0, 0))),
        compiler_params=pltpu.CompilerParams(dimension_semantics=("parallel",)),
    )(fmask, tag_bias, small4, opi_proj, pair_mask,
      fused["w_opi"], fused["b_opi"], fused["wq_key"], fused["wq_opi"],
      fused["q_b"], fused["wc_key"], fused["wc_opi"], fused["wc_ctx"],
      fused["cls_b"])


# -------------------- aspect boundary mask (vectorized glue) ------------------

def aspect_fusion_mask(asp_tags):
    """tag==2 opens, >2 continues, <2 closes (exclusive); open-at-end -> diag only."""
    _, s = asp_tags.shape
    idx = jnp.broadcast_to(jnp.arange(s, dtype=jnp.int32), asp_tags.shape)
    last_b = jax.lax.cummax(jnp.where(asp_tags == 2, idx, -1), axis=1)
    last_brk = jax.lax.cummax(jnp.where(asp_tags < 2, idx, -1), axis=1)
    alive = last_b > last_brk
    span_start = jnp.where(alive, last_b, -2)
    open_end = alive[:, -1:]
    end_start = span_start[:, -1:]
    closed = alive & jnp.logical_not(open_end & (span_start == end_start))
    same = (closed[:, :, None] & closed[:, None, :]
            & (span_start[:, :, None] == span_start[:, None, :]))
    m = jnp.maximum(jnp.eye(s, dtype=jnp.float32)[None], same.astype(jnp.float32))
    return m / jnp.sum(m, axis=2, keepdims=True)          # row sum >= 1, never NaN


# -------------------------------- parameters ---------------------------------

def init_params(key):
    ks = jax.random.split(key, 24)
    u = lambda k, shape, scale=0.1: jax.random.uniform(
        k, shape, jnp.float32, -scale, scale)
    asp_scale = math.sqrt(3.0 / ASP_LABEL_DIM)
    attn_qdim = OPINION_FUSION_DIM + OPINION_INPUT_DIM
    cls_in = OPINION_FUSION_DIM + OPINION_INPUT_DIM + HEAD_DIM * NUM_HEAD
    return dict(
        word_emb=u(ks[0], (VOCAB, WORD_EMB_DIM)),
        asp_emb=u(ks[1], (ASP_LABEL_SIZE, ASP_LABEL_DIM), asp_scale),
        enc_w=u(ks[2], (WORD_EMB_DIM, ENCODER_DIM)),
        enc_b=u(ks[3], (ENCODER_DIM,)),
        asp2tag_w=u(ks[4], (ENCODER_DIM, ASP_LABEL_SIZE)),
        asp2tag_b=u(ks[5], (ASP_LABEL_SIZE,)),
        asp_key_w=u(ks[6], (ENCODER_DIM + ASP_LABEL_DIM, OPINION_INPUT_DIM)),
        asp_key_b=u(ks[7], (OPINION_INPUT_DIM,)),
        asp_nonkey_w=u(ks[8], (ENCODER_DIM, OPINION_INPUT_DIM)),
        asp_nonkey_b=u(ks[9], (OPINION_INPUT_DIM,)),
        opi2tag_w=u(ks[10], (OPINION_INPUT_DIM, OPI_LABEL_SIZE)),
        opi2tag_b=u(ks[11], (OPI_LABEL_SIZE,)),
        opi_lin_w=u(ks[12], (ENCODER_DIM, OPINION_FUSION_DIM)),
        opi_lin_b=u(ks[13], (OPINION_FUSION_DIM,)),
        attn_q_w=u(ks[14], (attn_qdim, NUM_HEAD * HEAD_DIM)),
        attn_q_b=u(ks[15], (NUM_HEAD * HEAD_DIM,)),
        attn_k_w=u(ks[16], (ENCODER_DIM, NUM_HEAD * HEAD_DIM)),
        attn_k_b=u(ks[17], (NUM_HEAD * HEAD_DIM,)),
        attn_v_w=u(ks[18], (ENCODER_DIM, NUM_HEAD * HEAD_DIM)),
        attn_v_b=u(ks[19], (NUM_HEAD * HEAD_DIM,)),
        cls_w=u(ks[20], (cls_in, POLAR_SIZE)),
        cls_b=u(ks[21], (POLAR_SIZE,)),
    )


def prepare_fused_params(params):
    """Reorder/split weights once: bf16 MXU operands, f32 biases, lane-aligned stack."""
    bf16 = jnp.bfloat16
    w_big = jnp.concatenate([
        params["asp_nonkey_w"],                       # lanes   0: 32
        params["asp_key_w"][:ENCODER_DIM, :],         # lanes  32: 64 (encoder part)
        params["attn_k_w"],                           # lanes  64: 96
        params["attn_v_w"],                           # lanes  96:128
        params["opi_lin_w"],                          # lanes 128:428
    ], axis=1)
    b_big = jnp.concatenate([
        params["asp_nonkey_b"],
        jnp.zeros((OPINION_INPUT_DIM,), jnp.float32),  # asp_key bias folded into tag table
        params["attn_k_b"], params["attn_v_b"], params["opi_lin_b"],
    ], axis=0)
    # asp_key = fmask @ (seq_out @ W_key_enc) + tag_table[asp_tag_seq]
    tag_table = (params["asp_emb"] @ params["asp_key_w"][ENCODER_DIM:, :]
                 + params["asp_key_b"])
    return dict(
        enc_w=params["enc_w"].astype(bf16),
        enc_b=params["enc_b"].reshape(1, -1),
        w_big=w_big.astype(bf16),
        b_big=b_big.reshape(1, -1),
        w_asp=params["asp2tag_w"].astype(bf16),
        b_asp=params["asp2tag_b"].reshape(1, -1),
        tag_table=tag_table,
        w_opi=params["opi2tag_w"].astype(bf16),
        b_opi=params["opi2tag_b"].reshape(1, -1),
        wq_key=params["attn_q_w"][:OPINION_INPUT_DIM, :].astype(bf16),
        wq_opi=params["attn_q_w"][OPINION_INPUT_DIM:, :].astype(bf16),
        q_b=params["attn_q_b"].reshape(1, -1),
        wc_key=params["cls_w"][:OPINION_INPUT_DIM, :].astype(bf16),
        wc_opi=params["cls_w"][OPINION_INPUT_DIM:
                               OPINION_INPUT_DIM + OPINION_FUSION_DIM, :].astype(bf16),
        wc_ctx=params["cls_w"][OPINION_INPUT_DIM + OPINION_FUSION_DIM:, :].astype(bf16),
        cls_b=params["cls_b"].reshape(1, -1),
    )


# --------------------------------- forward -----------------------------------

def opinion_mining_forward(params, fused, all_input_ids, all_input_mask):
    bsz, s = all_input_ids.shape
    maskf = all_input_mask.astype(jnp.float32)

    # WordEmbedding: plain word lookup, masked.
    # TODO(synk): char-level branch of WordEmbedding (char ids / recover) not modeled.
    word_emb = (params["word_emb"][all_input_ids] * maskf[:, :, None])
    x = word_emb.astype(jnp.bfloat16).reshape(bsz * s, WORD_EMB_DIM)

    # Kernel 1: encoder + every projection of sequence_output (lane-aligned outputs).
    asp_flat, small4_flat, opi_flat = encode_and_project(x, fused)
    asp_out = asp_flat.reshape(bsz, s, ASP_LABEL_SIZE)
    small4 = small4_flat.reshape(bsz, s, SMALL4_DIM)
    opi_proj = opi_flat.reshape(bsz, s, OPINION_FUSION_DIM)

    # Aspect tagging (unmasked argmax, as in the reference) + fusion mask.
    asp_tag_seq = jnp.argmax(asp_out, axis=2).astype(jnp.int32)          # (B,S)
    fmask = aspect_fusion_mask(asp_tag_seq)                              # (B,S,S)
    tag_bias = fused["tag_table"][asp_tag_seq]                           # (B,S,32)
    pair_mask = (all_input_mask[:, :, None] *
                 all_input_mask[:, None, :]).astype(jnp.int32)           # (B,S,S)

    # Kernel 2: aspect fusion + pairwise opinion logits + argmax + opinion
    # boundary mask + opinion fusion + attention + polarity classification.
    opi_logits, opi_tag_seq, probs, preds = fused_opinion_polarity(
        fmask, tag_bias, small4, opi_proj, pair_mask, fused)

    opi_out = opi_logits.reshape(bsz * s * s, OPI_LABEL_SIZE)
    preds = preds.reshape(bsz, s)
    return asp_tag_seq, opi_tag_seq, preds, asp_out, opi_out, probs


# ----------------------------------- main -------------------------------------

if __name__ == "__main__":
    key = jax.random.PRNGKey(0)
    pkey, dkey = jax.random.split(key)
    params = init_params(pkey)
    fused = prepare_fused_params(params)

    B, S = 2, 8
    all_input_ids = jax.random.randint(dkey, (B, S), 1, VOCAB, dtype=jnp.int32)
    lengths = jnp.array([S, S - 2], dtype=jnp.int32)
    all_input_mask = (jnp.arange(S)[None, :] < lengths[:, None]).astype(jnp.int32)

    fwd = jax.jit(opinion_mining_forward)
    outs = jax.block_until_ready(fwd(params, fused, all_input_ids, all_input_mask))

    asp_tag_seq, opi_tag_seq, preds, asp_out, opi_out, probs = outs
    assert asp_tag_seq.shape == (B, S)
    assert opi_tag_seq.shape == (B, S, S)
    assert preds.shape == (B, S)
    assert asp_out.shape == (B, S, ASP_LABEL_SIZE)
    assert opi_out.shape == (B * S * S, OPI_LABEL_SIZE)
    assert probs.shape == (B, S, POLAR_SIZE)
    assert bool(jnp.all(jnp.isfinite(probs)))
    assert bool(jnp.all((preds >= 0) & (preds < POLAR_SIZE)))
    assert bool(jnp.all((opi_tag_seq >= 0) & (opi_tag_seq < OPI_LABEL_SIZE)))
    print("KERNEL_OK")
</pallas_src>

<mosaic_0001>
module attributes {stable_mosaic.version = 11 : i64} {
  func.func @_encode_project_kernel(%arg0: i32, %arg1: memref<16x32xbf16, #tpu.memory_space<vmem>>, %arg2: memref<32x32xbf16, #tpu.memory_space<vmem>>, %arg3: memref<1x32xf32, #tpu.memory_space<vmem>>, %arg4: memref<32x428xbf16, #tpu.memory_space<vmem>>, %arg5: memref<1x428xf32, #tpu.memory_space<vmem>>, %arg6: memref<32x5xbf16, #tpu.memory_space<vmem>>, %arg7: memref<1x5xf32, #tpu.memory_space<vmem>>, %arg8: memref<16x5xf32, #tpu.memory_space<vmem>>, %arg9: memref<16x128xf32, #tpu.memory_space<vmem>>, %arg10: memref<16x300xf32, #tpu.memory_space<vmem>>) attributes {dimension_semantics = [#tpu.dimension_semantics<parallel>], iteration_bounds = array<i64: 1>, scalar_prefetch = 0 : i64, scratch_operands = 0 : i64, tpu.core_type = #tpu.core_type<tc>, window_params = [{transform_indices = @transform_0, window_bounds = array<i64: 16, 32>}, {pipeline_mode = #tpu.pipeline_mode<synchronous>, transform_indices = @transform_1, window_bounds = array<i64: 32, 32>}, {pipeline_mode = #tpu.pipeline_mode<synchronous>, transform_indices = @transform_2, window_bounds = array<i64: 1, 32>}, {pipeline_mode = #tpu.pipeline_mode<synchronous>, transform_indices = @transform_3, window_bounds = array<i64: 32, 428>}, {pipeline_mode = #tpu.pipeline_mode<synchronous>, transform_indices = @transform_4, window_bounds = array<i64: 1, 428>}, {pipeline_mode = #tpu.pipeline_mode<synchronous>, transform_indices = @transform_5, window_bounds = array<i64: 32, 5>}, {pipeline_mode = #tpu.pipeline_mode<synchronous>, transform_indices = @transform_6, window_bounds = array<i64: 1, 5>}, {transform_indices = @transform_7, window_bounds = array<i64: 16, 5>}, {transform_indices = @transform_8, window_bounds = array<i64: 16, 128>}, {transform_indices = @transform_9, window_bounds = array<i64: 16, 300>}]} {
    %c0 = arith.constant 0 : index
    %c0_0 = arith.constant 0 : index
    %0 = vector.load %arg1[%c0, %c0_0] : memref<16x32xbf16, #tpu.memory_space<vmem>>, vector<16x32xbf16>
    %c0_1 = arith.constant 0 : index
    %c0_2 = arith.constant 0 : index
    %1 = vector.load %arg2[%c0_1, %c0_2] : memref<32x32xbf16, #tpu.memory_space<vmem>>, vector<32x32xbf16>
    %cst = arith.constant dense<0.000000e+00> : vector<16x32xf32>
    %2 = tpu.matmul %0, %1, %cst {dimension_numbers = #tpu.dot_dimension_numbers<[1], [0], [0], [1], [0, 0, 1, 1], [], []>} : vector<16x32xbf16>, vector<32x32xbf16>, vector<16x32xf32> -> vector<16x32xf32>
    %c0_3 = arith.constant 0 : index
    %c0_4 = arith.constant 0 : index
    %3 = vector.load %arg3[%c0_3, %c0_4] : memref<1x32xf32, #tpu.memory_space<vmem>>, vector<1x32xf32>
    %4 = vector.broadcast %3 : vector<1x32xf32> to vector<16x32xf32>
    %5 = arith.addf %2, %4 : vector<16x32xf32>
    %6 = math.tanh %5 : vector<16x32xf32>
    %7 = arith.truncf %6 : vector<16x32xf32> to vector<16x32xbf16>
    %c0_5 = arith.constant 0 : index
    %c0_6 = arith.constant 0 : index
    %8 = vector.load %arg4[%c0_5, %c0_6] : memref<32x428xbf16, #tpu.memory_space<vmem>>, vector<32x428xbf16>
    %cst_7 = arith.constant dense<0.000000e+00> : vector<16x428xf32>
    %9 = tpu.matmul %7, %8, %cst_7 {dimension_numbers = #tpu.dot_dimension_numbers<[1], [0], [0], [1], [0, 0, 1, 1], [], []>} : vector<16x32xbf16>, vector<32x428xbf16>, vector<16x428xf32> -> vector<16x428xf32>
    %c0_8 = arith.constant 0 : index
    %c0_9 = arith.constant 0 : index
    %10 = vector.load %arg5[%c0_8, %c0_9] : memref<1x428xf32, #tpu.memory_space<vmem>>, vector<1x428xf32>
    %11 = vector.broadcast %10 : vector<1x428xf32> to vector<16x428xf32>
    %12 = arith.addf %9, %11 : vector<16x428xf32>
    %13 = vector.extract_strided_slice %12 {offsets = [0, 0], sizes = [16, 128], strides = [1, 1]} : vector<16x428xf32> to vector<16x128xf32>
    %c0_10 = arith.constant 0 : index
    %c0_11 = arith.constant 0 : index
    %14 = vector.load %arg9[%c0_10, %c0_11] : memref<16x128xf32, #tpu.memory_space<vmem>>, vector<16x128xf32>
    tpu.vector_store %arg9[%c0_10, %c0_11], %13 {strides = array<i32>} : memref<16x128xf32, #tpu.memory_space<vmem>>, vector<16x128xf32>,
    %15 = vector.extract_strided_slice %12 {offsets = [0, 128], sizes = [16, 300], strides = [1, 1]} : vector<16x428xf32> to vector<16x300xf32>
    %c0_12 = arith.constant 0 : index
    %c0_13 = arith.constant 0 : index
    %16 = vector.load %arg10[%c0_12, %c0_13] : memref<16x300xf32, #tpu.memory_space<vmem>>, vector<16x300xf32>
    tpu.vector_store %arg10[%c0_12, %c0_13], %15 {strides = array<i32>} : memref<16x300xf32, #tpu.memory_space<vmem>>, vector<16x300xf32>,
    %c0_14 = arith.constant 0 : index
    %c0_15 = arith.constant 0 : index
    %17 = vector.load %arg6[%c0_14, %c0_15] : memref<32x5xbf16, #tpu.memory_space<vmem>>, vector<32x5xbf16>
    %cst_16 = arith.constant dense<0.000000e+00> : vector<16x5xf32>
    %18 = tpu.matmul %7, %17, %cst_16 {dimension_numbers = #tpu.dot_dimension_numbers<[1], [0], [0], [1], [0, 0, 1, 1], [], []>} : vector<16x32xbf16>, vector<32x5xbf16>, vector<16x5xf32> -> vector<16x5xf32>
    %c0_17 = arith.constant 0 : index
    %c0_18 = arith.constant 0 : index
    %19 = vector.load %arg7[%c0_17, %c0_18] : memref<1x5xf32, #tpu.memory_space<vmem>>, vector<1x5xf32>
    %20 = vector.broadcast %19 : vector<1x5xf32> to vector<16x5xf32>
    %21 = arith.addf %18, %20 : vector<16x5xf32>
    %c0_19 = arith.constant 0 : index
    %c0_20 = arith.constant 0 : index
    %22 = vector.load %arg8[%c0_19, %c0_20] : memref<16x5xf32, #tpu.memory_space<vmem>>, vector<16x5xf32>
    tpu.vector_store %arg8[%c0_19, %c0_20], %21 {strides = array<i32>} : memref<16x5xf32, #tpu.memory_space<vmem>>, vector<16x5xf32>,
    return
  }
  func.func @transform_0(%arg0: i32) -> (i32, i32) {
    %c0_i32 = arith.constant 0 : i32
    %c0_i32_0 = arith.constant 0 : i32
    return %arg0, %c0_i32 : i32, i32
  }
  func.func @transform_1(%arg0: i32) -> (i32, i32) {
    %c0_i32 = arith.constant 0 : i32
    %c0_i32_0 = arith.constant 0 : i32
    %c0_i32_1 = arith.constant 0 : i32
    return %c0_i32, %c0_i32_0 : i32, i32
  }
  func.func @transform_2(%arg0: i32) -> (i32, i32) {
    %c0_i32 = arith.constant 0 : i32
    %c0_i32_0 = arith.constant 0 : i32
    %c0_i32_1 = arith.constant 0 : i32
    return %c0_i32, %c0_i32_0 : i32, i32
  }
  func.func @transform_3(%arg0: i32) -> (i32, i32) {
    %c0_i32 = arith.constant 0 : i32
    %c0_i32_0 = arith.constant 0 : i32
    %c0_i32_1 = arith.constant 0 : i32
    return %c0_i32, %c0_i32_0 : i32, i32
  }
  func.func @transform_4(%arg0: i32) -> (i32, i32) {
    %c0_i32 = arith.constant 0 : i32
    %c0_i32_0 = arith.constant 0 : i32
    %c0_i32_1 = arith.constant 0 : i32
    return %c0_i32, %c0_i32_0 : i32, i32
  }
  func.func @transform_5(%arg0: i32) -> (i32, i32) {
    %c0_i32 = arith.constant 0 : i32
    %c0_i32_0 = arith.constant 0 : i32
    %c0_i32_1 = arith.constant 0 : i32
    return %c0_i32, %c0_i32_0 : i32, i32
  }
  func.func @transform_6(%arg0: i32) -> (i32, i32) {
    %c0_i32 = arith.constant 0 : i32
    %c0_i32_0 = arith.constant 0 : i32
    %c0_i32_1 = arith.constant 0 : i32
    return %c0_i32, %c0_i32_0 : i32, i32
  }
  func.func @transform_7(%arg0: i32) -> (i32, i32) {
    %c0_i32 = arith.constant 0 : i32
    %c0_i32_0 = arith.constant 0 : i32
    return %arg0, %c0_i32 : i32, i32
  }
  func.func @transform_8(%arg0: i32) -> (i32, i32) {
    %c0_i32 = arith.constant 0 : i32
    %c0_i32_0 = arith.constant 0 : i32
    return %arg0, %c0_i32 : i32, i32
  }
  func.func @transform_9(%arg0: i32) -> (i32, i32) {
    %c0_i32 = arith.constant 0 : i32
    %c0_i32_0 = arith.constant 0 : i32
    return %arg0, %c0_i32 : i32, i32
  }
}

module attributes {stable_mosaic.version = 11 : i64} {
  func.func @_fused_opinion_kernel(%arg0: i32, %arg1: memref<1x8x8xf32, #tpu.memory_space<vmem>>, %arg2: memref<1x8x32xf32, #tpu.memory_space<vmem>>, %arg3: memref<1x8x128xf32, #tpu.memory_space<vmem>>, %arg4: memref<1x8x300xf32, #tpu.memory_space<vmem>>, %arg5: memref<1x8x8xi32, #tpu.memory_space<vmem>>, %arg6: memref<32x4xbf16, #tpu.memory_space<vmem>>, %arg7: memref<1x4xf32, #tpu.memory_space<vmem>>, %arg8: memref<32x32xbf16, #tpu.memory_space<vmem>>, %arg9: memref<300x32xbf16, #tpu.memory_space<vmem>>, %arg10: memref<1x32xf32, #tpu.memory_space<vmem>>, %arg11: memref<32x4xbf16, #tpu.memory_space<vmem>>, %arg12: memref<300x4xbf16, #tpu.memory_space<vmem>>, %arg13: memref<32x4xbf16, #tpu.memory_space<vmem>>, %arg14: memref<1x4xf32, #tpu.memory_space<vmem>>, %arg15: memref<1x8x8x4xf32, #tpu.memory_space<vmem>>, %arg16: memref<1x8x8xi32, #tpu.memory_space<vmem>>, %arg17: memref<1x8x4xf32, #tpu.memory_space<vmem>>, %arg18: memref<1x8x1xi32, #tpu.memory_space<vmem>>) attributes {dimension_semantics = [#tpu.dimension_semantics<parallel>], iteration_bounds = array<i64: 2>, scalar_prefetch = 0 : i64, scratch_operands = 0 : i64, tpu.core_type = #tpu.core_type<tc>, window_params = [{transform_indices = @transform_0, window_bounds = array<i64: 1, 8, 8>}, {transform_indices = @transform_1, window_bounds = array<i64: 1, 8, 32>}, {transform_indices = @transform_2, window_bounds = array<i64: 1, 8, 128>}, {transform_indices = @transform_3, window_bounds = array<i64: 1, 8, 300>}, {transform_indices = @transform_4, window_bounds = array<i64: 1, 8, 8>}, {pipeline_mode = #tpu.pipeline_mode<synchronous>, transform_indices = @transform_5, window_bounds = array<i64: 32, 4>}, {pipeline_mode = #tpu.pipeline_mode<synchronous>, transform_indices = @transform_6, window_bounds = array<i64: 1, 4>}, {pipeline_mode = #tpu.pipeline_mode<synchronous>, transform_indices = @transform_7, window_bounds = array<i64: 32, 32>}, {pipeline_mode = #tpu.pipeline_mode<synchronous>, transform_indices = @transform_8, window_bounds = array<i64: 300, 32>}, {pipeline_mode = #tpu.pipeline_mode<synchronous>, transform_indices = @transform_9, window_bounds = array<i64: 1, 32>}, {pipeline_mode = #tpu.pipeline_mode<synchronous>, transform_indices = @transform_10, window_bounds = array<i64: 32, 4>}, {pipeline_mode = #tpu.pipeline_mode<synchronous>, transform_indices = @transform_11, window_bounds = array<i64: 300, 4>}, {pipeline_mode = #tpu.pipeline_mode<synchronous>, transform_indices = @transform_12, window_bounds = array<i64: 32, 4>}, {pipeline_mode = #tpu.pipeline_mode<synchronous>, transform_indices = @transform_13, window_bounds = array<i64: 1, 4>}, {transform_indices = @transform_14, window_bounds = array<i64: 1, 8, 8, 4>}, {transform_indices = @transform_15, window_bounds = array<i64: 1, 8, 8>}, {transform_indices = @transform_16, window_bounds = array<i64: 1, 8, 4>}, {transform_indices = @transform_17, window_bounds = array<i64: 1, 8, 1>}]} {
    %c0 = arith.constant 0 : index
    %c0_0 = arith.constant 0 : index
    %c0_1 = arith.constant 0 : index
    %0 = vector.load %arg3[%c0, %c0_0, %c0_1] : memref<1x8x128xf32, #tpu.memory_space<vmem>>, vector<1x8x128xf32>
    %1 = vector.shape_cast %0 : vector<1x8x128xf32> to vector<8x128xf32>
    %2 = vector.extract_strided_slice %1 {offsets = [0, 0], sizes = [8, 32], strides = [1, 1]} : vector<8x128xf32> to vector<8x32xf32>
    %3 = vector.extract_strided_slice %1 {offsets = [0, 32], sizes = [8, 32], strides = [1, 1]} : vector<8x128xf32> to vector<8x32xf32>
    %4 = vector.extract_strided_slice %1 {offsets = [0, 64], sizes = [8, 32], strides = [1, 1]} : vector<8x128xf32> to vector<8x32xf32>
    %5 = vector.extract_strided_slice %1 {offsets = [0, 96], sizes = [8, 32], strides = [1, 1]} : vector<8x128xf32> to vector<8x32xf32>
    %c0_2 = arith.constant 0 : index
    %c0_3 = arith.constant 0 : index
    %c0_4 = arith.constant 0 : index
    %6 = vector.load %arg1[%c0_2, %c0_3, %c0_4] : memref<1x8x8xf32, #tpu.memory_space<vmem>>, vector<1x8x8xf32>
    %7 = vector.shape_cast %6 : vector<1x8x8xf32> to vector<8x8xf32>
    %cst = arith.constant dense<0.000000e+00> : vector<8x32xf32>
    %8 = tpu.matmul %7, %3, %cst {dimension_numbers = #tpu.dot_dimension_numbers<[1], [0], [0], [1], [0, 0, 1, 1], [], []>} : vector<8x8xf32>, vector<8x32xf32>, vector<8x32xf32> -> vector<8x32xf32>
    %c0_5 = arith.constant 0 : index
    %c0_6 = arith.constant 0 : index
    %c0_7 = arith.constant 0 : index
    %9 = vector.load %arg2[%c0_5, %c0_6, %c0_7] : memref<1x8x32xf32, #tpu.memory_space<vmem>>, vector<1x8x32xf32>
    %10 = vector.shape_cast %9 : vector<1x8x32xf32> to vector<8x32xf32>
    %11 = arith.addf %8, %10 : vector<8x32xf32>
    %12 = vector.shape_cast %11 : vector<8x32xf32> to vector<8x1x32xf32>
    %13 = vector.shape_cast %2 : vector<8x32xf32> to vector<1x8x32xf32>
    %14 = vector.broadcast %12 : vector<8x1x32xf32> to vector<8x8x32xf32>
    %15 = vector.broadcast %13 : vector<1x8x32xf32> to vector<8x8x32xf32>
    %16 = arith.addf %14, %15 : vector<8x8x32xf32>
    %cst_8 = arith.constant 0.000000e+00 : f32
    %17 = vector.broadcast %cst_8 : f32 to vector<8x8x32xf32>
    %18 = arith.maximumf %16, %17 : vector<8x8x32xf32>
    %19 = vector.shape_cast %18 : vector<8x8x32xf32> to vector<64x32xf32>
    %20 = arith.truncf %19 : vector<64x32xf32> to vector<64x32xbf16>
    %c0_9 = arith.constant 0 : index
    %c0_10 = arith.constant 0 : index
    %21 = vector.load %arg6[%c0_9, %c0_10] : memref<32x4xbf16, #tpu.memory_space<vmem>>, vector<32x4xbf16>
    %cst_11 = arith.constant dense<0.000000e+00> : vector<64x4xf32>
    %22 = tpu.matmul %20, %21, %cst_11 {dimension_numbers = #tpu.dot_dimension_numbers<[1], [0], [0], [1], [0, 0, 1, 1], [], []>} : vector<64x32xbf16>, vector<32x4xbf16>, vector<64x4xf32> -> vector<64x4xf32>
    %c0_12 = arith.constant 0 : index
    %c0_13 = arith.constant 0 : index
    %23 = vector.load %arg7[%c0_12, %c0_13] : memref<1x4xf32, #tpu.memory_space<vmem>>, vector<1x4xf32>
    %24 = vector.broadcast %23 : vector<1x4xf32> to vector<64x4xf32>
    %25 = arith.addf %22, %24 : vector<64x4xf32>
    %26 = vector.shape_cast %25 : vector<64x4xf32> to vector<8x8x4xf32>
    %c0_14 = arith.constant 0 : index
    %c0_15 = arith.constant 0 : index
    %c0_16 = arith.constant 0 : index
    %c0_17 = arith.constant 0 : index
    %27 = vector.load %arg15[%c0_14, %c0_15, %c0_16, %c0_17] : memref<1x8x8x4xf32, #tpu.memory_space<vmem>>, vector<1x8x8x4xf32>
    %28 = vector.shape_cast %27 : vector<1x8x8x4xf32> to vector<8x8x4xf32>
    %29 = vector.shape_cast %26 : vector<8x8x4xf32> to vector<1x8x8x4xf32>
    tpu.vector_store %arg15[%c0_14, %c0_15, %c0_16, %c0_17], %29 {strides = array<i32>} : memref<1x8x8x4xf32, #tpu.memory_space<vmem>>, vector<1x8x8x4xf32>,
    %cst_18 = arith.constant dense<0xFF800000> : vector<8x8xf32>
    %30 = vector.multi_reduction <maximumf>, %26, %cst_18 [2] : vector<8x8x4xf32> to vector<8x8xf32>
    %31 = vector.shape_cast %30 : vector<8x8xf32> to vector<8x8x1xf32>
    %32 = tpu.iota {dimensions = array<i32: 2>} : vector<8x8x4xi32>
    %33 = vector.broadcast %31 : vector<8x8x1xf32> to vector<8x8x4xf32>
    %34 = arith.cmpf oge, %26, %33 : vector<8x8x4xf32>
    %c4_i32 = arith.constant 4 : i32
    %35 = vector.broadcast %c4_i32 : i32 to vector<8x8x4xi32>
    %36 = arith.select %34, %32, %35 : vector<8x8x4xi1>, vector<8x8x4xi32>
    %cst_19 = arith.constant dense<2147483647> : vector<8x8xi32>
    %37 = vector.multi_reduction <minsi>, %36, %cst_19 [2] : vector<8x8x4xi32> to vector<8x8xi32>
    %c0_20 = arith.constant 0 : index
    %c0_21 = arith.constant 0 : index
    %c0_22 = arith.constant 0 : index
    %38 = vector.load %arg5[%c0_20, %c0_21, %c0_22] : memref<1x8x8xi32, #tpu.memory_space<vmem>>, vector<1x8x8xi32>
    %39 = vector.shape_cast %38 : vector<1x8x8xi32> to vector<8x8xi32>
    %40 = arith.muli %37, %39 : vector<8x8xi32>
    %c0_23 = arith.constant 0 : index
    %c0_24 = arith.constant 0 : index
    %c0_25 = arith.constant 0 : index
    %41 = vector.load %arg16[%c0_23, %c0_24, %c0_25] : memref<1x8x8xi32, #tpu.memory_space<vmem>>, vector<1x8x8xi32>
    %42 = vector.shape_cast %41 : vector<1x8x8xi32> to vector<8x8xi32>
    %43 = vector.shape_cast %40 : vector<8x8xi32> to vector<1x8x8xi32>
    tpu.vector_store %arg16[%c0_23, %c0_24, %c0_25], %43 {strides = array<i32>} : memref<1x8x8xi32, #tpu.memory_space<vmem>>, vector<1x8x8xi32>,
    %44 = tpu.iota {dimensions = array<i32: 2>} : vector<8x8x8xi32>
    %45 = tpu.iota {dimensions = array<i32: 1>} : vector<8x8x8xi32>
    %46 = vector.shape_cast %40 : vector<8x8xi32> to vector<8x1x8xi32>
    %47 = arith.cmpi sle, %44, %45 : vector<8x8x8xi32>
    %c2_i32 = arith.constant 2 : i32
    %48 = vector.broadcast %c2_i32 : i32 to vector<8x1x8xi32>
    %49 = arith.cmpi eq, %46, %48 : vector<8x1x8xi32>
    %50 = vector.broadcast %49 : vector<8x1x8xi1> to vector<8x8x8xi1>
    %51 = arith.andi %47, %50 : vector<8x8x8xi1>
    %c-1_i32 = arith.constant -1 : i32
    %52 = vector.broadcast %c-1_i32 : i32 to vector<8x8x8xi32>
    %53 = arith.select %51, %44, %52 : vector<8x8x8xi1>, vector<8x8x8xi32>
    %cst_26 = arith.constant dense<-2147483648> : vector<8x8xi32>
    %54 = vector.multi_reduction <maxsi>, %53, %cst_26 [2] : vector<8x8x8xi32> to vector<8x8xi32>
    %c2_i32_27 = arith.constant 2 : i32
    %55 = vector.broadcast %c2_i32_27 : i32 to vector<8x1x8xi32>
    %56 = arith.cmpi slt, %46, %55 : vector<8x1x8xi32>
    %57 = vector.broadcast %56 : vector<8x1x8xi1> to vector<8x8x8xi1>
    %58 = arith.andi %47, %57 : vector<8x8x8xi1>
    %c-1_i32_28 = arith.constant -1 : i32
    %59 = vector.broadcast %c-1_i32_28 : i32 to vector<8x8x8xi32>
    %60 = arith.select %58, %44, %59 : vector<8x8x8xi1>, vector<8x8x8xi32>
    %cst_29 = arith.constant dense<-2147483648> : vector<8x8xi32>
    %61 = vector.multi_reduction <maxsi>, %60, %cst_29 [2] : vector<8x8x8xi32> to vector<8x8xi32>
    %62 = arith.cmpi sgt, %54, %61 : vector<8x8xi32>
    %c-2_i32 = arith.constant -2 : i32
    %63 = vector.broadcast %c-2_i32 : i32 to vector<8x8xi32>
    %64 = arith.select %62, %54, %63 : vector<8x8xi1>, vector<8x8xi32>
    %65 = vector.extract_strided_slice %62 {offsets = [0, 7], sizes = [8, 1], strides = [1, 1]} : vector<8x8xi1> to vector<8x1xi1>
    %66 = vector.extract_strided_slice %64 {offsets = [0, 7], sizes = [8, 1], strides = [1, 1]} : vector<8x8xi32> to vector<8x1xi32>
    %67 = vector.broadcast %66 : vector<8x1xi32> to vector<8x8xi32>
    %68 = arith.cmpi eq, %64, %67 : vector<8x8xi32>
    %69 = vector.broadcast %65 : vector<8x1xi1> to vector<8x8xi1>
    %70 = arith.andi %69, %68 : vector<8x8xi1>
    %cst_30 = arith.constant dense<true> : vector<8x8xi1>
    %71 = arith.xori %70, %cst_30 : vector<8x8xi1>
    %72 = arith.andi %62, %71 : vector<8x8xi1>
    %73 = tpu.iota {dimensions = array<i32: 0>} : vector<8x8xi32>
    %74 = tpu.iota {dimensions = array<i32: 1>} : vector<8x8xi32>
    %75 = arith.cmpi eq, %73, %74 : vector<8x8xi32>
    %76 = arith.extui %75 : vector<8x8xi1> to vector<8x8xi32>
    %77 = arith.sitofp %76 : vector<8x8xi32> to vector<8x8xf32>
    %78 = arith.extui %72 : vector<8x8xi1> to vector<8x8xi32>
    %79 = arith.sitofp %78 : vector<8x8xi32> to vector<8x8xf32>
    %80 = arith.maximumf %77, %79 : vector<8x8xf32>
    %c7_i32 = arith.constant 7 : i32
    %81 = vector.broadcast %c7_i32 : i32 to vector<8x8xi32>
    %82 = arith.cmpi eq, %74, %81 : vector<8x8xi32>
    %83 = vector.broadcast %65 : vector<8x1xi1> to vector<8x8xi1>
    %84 = arith.andi %83, %82 : vector<8x8xi1>
    %85 = arith.extui %84 : vector<8x8xi1> to vector<8x8xi32>
    %86 = arith.sitofp %85 : vector<8x8xi32> to vector<8x8xf32>
    %87 = arith.maximumf %80, %86 : vector<8x8xf32>
    %cst_31 = arith.constant dense<0.000000e+00> : vector<8xf32>
    %88 = vector.multi_reduction <add>, %87, %cst_31 [1] : vector<8x8xf32> to vector<8xf32>
    %89 = vector.shape_cast %88 : vector<8xf32> to vector<8x1xf32>
    %90 = vector.broadcast %89 : vector<8x1xf32> to vector<8x8xf32>
    %91 = arith.divf %87, %90 : vector<8x8xf32>
    %c0_32 = arith.constant 0 : index
    %c0_33 = arith.constant 0 : index
    %c0_34 = arith.constant 0 : index
    %92 = vector.load %arg4[%c0_32, %c0_33, %c0_34] : memref<1x8x300xf32, #tpu.memory_space<vmem>>, vector<1x8x300xf32>
    %93 = vector.shape_cast %92 : vector<1x8x300xf32> to vector<8x300xf32>
    %cst_35 = arith.constant dense<0.000000e+00> : vector<8x300xf32>
    %94 = tpu.matmul %91, %93, %cst_35 {dimension_numbers = #tpu.dot_dimension_numbers<[1], [0], [0], [1], [0, 0, 1, 1], [], []>} : vector<8x8xf32>, vector<8x300xf32>, vector<8x300xf32> -> vector<8x300xf32>
    %95 = arith.truncf %11 : vector<8x32xf32> to vector<8x32xbf16>
    %96 = arith.truncf %94 : vector<8x300xf32> to vector<8x300xbf16>
    %c0_36 = arith.constant 0 : index
    %c0_37 = arith.constant 0 : index
    %97 = vector.load %arg8[%c0_36, %c0_37] : memref<32x32xbf16, #tpu.memory_space<vmem>>, vector<32x32xbf16>
    %cst_38 = arith.constant dense<0.000000e+00> : vector<8x32xf32>
    %98 = tpu.matmul %95, %97, %cst_38 {dimension_numbers = #tpu.dot_dimension_numbers<[1], [0], [0], [1], [0, 0, 1, 1], [], []>} : vector<8x32xbf16>, vector<32x32xbf16>, vector<8x32xf32> -> vector<8x32xf32>
    %c0_39 = arith.constant 0 : index
    %c0_40 = arith.constant 0 : index
    %99 = vector.load %arg9[%c0_39, %c0_40] : memref<300x32xbf16, #tpu.memory_space<vmem>>, vector<300x32xbf16>
    %cst_41 = arith.constant dense<0.000000e+00> : vector<8x32xf32>
    %100 = tpu.matmul %96, %99, %cst_41 {dimension_numbers = #tpu.dot_dimension_numbers<[1], [0], [0], [1], [0, 0, 1, 1], [], []>} : vector<8x300xbf16>, vector<300x32xbf16>, vector<8x32xf32> -> vector<8x32xf32>
    %101 = arith.addf %98, %100 : vector<8x32xf32>
    %c0_42 = arith.constant 0 : index
    %c0_43 = arith.constant 0 : index
    %102 = vector.load %arg10[%c0_42, %c0_43] : memref<1x32xf32, #tpu.memory_space<vmem>>, vector<1x32xf32>
    %103 = vector.broadcast %102 : vector<1x32xf32> to vector<8x32xf32>
    %104 = arith.addf %101, %103 : vector<8x32xf32>
    %c0_44 = arith.constant 0 : index
    %c0_45 = arith.constant 0 : index
    %105 = vector.load %arg11[%c0_44, %c0_45] : memref<32x4xbf16, #tpu.memory_space<vmem>>, vector<32x4xbf16>
    %cst_46 = arith.constant dense<0.000000e+00> : vector<8x4xf32>
    %106 = tpu.matmul %95, %105, %cst_46 {dimension_numbers = #tpu.dot_dimension_numbers<[1], [0], [0], [1], [0, 0, 1, 1], [], []>} : vector<8x32xbf16>, vector<32x4xbf16>, vector<8x4xf32> -> vector<8x4xf32>
    %c0_47 = arith.constant 0 : index
    %c0_48 = arith.constant 0 : index
    %107 = vector.load %arg12[%c0_47, %c0_48] : memref<300x4xbf16, #tpu.memory_space<vmem>>, vector<300x4xbf16>
    %cst_49 = arith.constant dense<0.000000e+00> : vector<8x4xf32>
    %108 = tpu.matmul %96, %107, %cst_49 {dimension_numbers = #tpu.dot_dimension_numbers<[1], [0], [0], [1], [0, 0, 1, 1], [], []>} : vector<8x300xbf16>, vector<300x4xbf16>, vector<8x4xf32> -> vector<8x4xf32>
    %109 = arith.addf %106, %108 : vector<8x4xf32>
    %c0_50 = arith.constant 0 : index
    %c0_51 = arith.constant 0 : index
    %110 = vector.load %arg14[%c0_50, %c0_51] : memref<1x4xf32, #tpu.memory_space<vmem>>, vector<1x4xf32>
    %111 = vector.broadcast %110 : vector<1x4xf32> to vector<8x4xf32>
    %112 = arith.addf %109, %111 : vector<8x4xf32>
    %c0_52 = arith.constant 0 : index
    %c0_53 = arith.constant 0 : index
    %113 = vector.load %arg13[%c0_52, %c0_53] : memref<32x4xbf16, #tpu.memory_space<vmem>>, vector<32x4xbf16>
    %114 = vector.extract_strided_slice %104 {offsets = [0, 0], sizes = [8, 16], strides = [1, 1]} : vector<8x32xf32> to vector<8x16xf32>
    %115 = vector.extract_strided_slice %4 {offsets = [0, 0], sizes = [8, 16], strides = [1, 1]} : vector<8x32xf32> to vector<8x16xf32>
    %116 = vector.extract_strided_slice %5 {offsets = [0, 0], sizes = [8, 16], strides = [1, 1]} : vector<8x32xf32> to vector<8x16xf32>
    %cst_54 = arith.constant dense<0.000000e+00> : vector<8x8xf32>
    %117 = tpu.matmul %114, %115, %cst_54 {dimension_numbers = #tpu.dot_dimension_numbers<[1], [1], [0], [0], [0, 0, 1, 0], [], []>} : vector<8x16xf32>, vector<8x16xf32>, vector<8x8xf32> -> vector<8x8xf32>
    %cst_55 = arith.constant 2.500000e-01 : f32
    %118 = vector.broadcast %cst_55 : f32 to vector<8x8xf32>
    %119 = arith.mulf %117, %118 : vector<8x8xf32>
    %cst_56 = arith.constant dense<0xFF800000> : vector<8xf32>
    %120 = vector.multi_reduction <maximumf>, %119, %cst_56 [1] : vector<8x8xf32> to vector<8xf32>
    %121 = vector.shape_cast %120 : vector<8xf32> to vector<8x1xf32>
    %122 = vector.broadcast %121 : vector<8x1xf32> to vector<8x8xf32>
    %123 = arith.subf %119, %122 : vector<8x8xf32>
    %124 = math.exp %123 : vector<8x8xf32>
    %cst_57 = arith.constant dense<0.000000e+00> : vector<8xf32>
    %125 = vector.multi_reduction <add>, %124, %cst_57 [1] : vector<8x8xf32> to vector<8xf32>
    %126 = vector.shape_cast %125 : vector<8xf32> to vector<8x1xf32>
    %127 = vector.broadcast %126 : vector<8x1xf32> to vector<8x8xf32>
    %128 = arith.divf %124, %127 : vector<8x8xf32>
    %cst_58 = arith.constant dense<0.000000e+00> : vector<8x16xf32>
    %129 = tpu.matmul %128, %116, %cst_58 {dimension_numbers = #tpu.dot_dimension_numbers<[1], [0], [0], [1], [0, 0, 1, 1], [], []>} : vector<8x8xf32>, vector<8x16xf32>, vector<8x16xf32> -> vector<8x16xf32>
    %130 = arith.truncf %129 : vector<8x16xf32> to vector<8x16xbf16>
    %131 = vector.extract_strided_slice %113 {offsets = [0, 0], sizes = [16, 4], strides = [1, 1]} : vector<32x4xbf16> to vector<16x4xbf16>
    %cst_59 = arith.constant dense<0.000000e+00> : vector<8x4xf32>
    %132 = tpu.matmul %130, %131, %cst_59 {dimension_numbers = #tpu.dot_dimension_numbers<[1], [0], [0], [1], [0, 0, 1, 1], [], []>} : vector<8x16xbf16>, vector<16x4xbf16>, vector<8x4xf32> -> vector<8x4xf32>
    %133 = arith.addf %112, %132 : vector<8x4xf32>
    %134 = vector.extract_strided_slice %104 {offsets = [0, 16], sizes = [8, 16], strides = [1, 1]} : vector<8x32xf32> to vector<8x16xf32>
    %135 = vector.extract_strided_slice %4 {offsets = [0, 16], sizes = [8, 16], strides = [1, 1]} : vector<8x32xf32> to vector<8x16xf32>
    %136 = vector.extract_strided_slice %5 {offsets = [0, 16], sizes = [8, 16], strides = [1, 1]} : vector<8x32xf32> to vector<8x16xf32>
    %cst_60 = arith.constant dense<0.000000e+00> : vector<8x8xf32>
    %137 = tpu.matmul %134, %135, %cst_60 {dimension_numbers = #tpu.dot_dimension_numbers<[1], [1], [0], [0], [0, 0, 1, 0], [], []>} : vector<8x16xf32>, vector<8x16xf32>, vector<8x8xf32> -> vector<8x8xf32>
    %cst_61 = arith.constant 2.500000e-01 : f32
    %138 = vector.broadcast %cst_61 : f32 to vector<8x8xf32>
    %139 = arith.mulf %137, %138 : vector<8x8xf32>
    %cst_62 = arith.constant dense<0xFF800000> : vector<8xf32>
    %140 = vector.multi_reduction <maximumf>, %139, %cst_62 [1] : vector<8x8xf32> to vector<8xf32>
    %141 = vector.shape_cast %140 : vector<8xf32> to vector<8x1xf32>
    %142 = vector.broadcast %141 : vector<8x1xf32> to vector<8x8xf32>
    %143 = arith.subf %139, %142 : vector<8x8xf32>
    %144 = math.exp %143 : vector<8x8xf32>
    %cst_63 = arith.constant dense<0.000000e+00> : vector<8xf32>
    %145 = vector.multi_reduction <add>, %144, %cst_63 [1] : vector<8x8xf32> to vector<8xf32>
    %146 = vector.shape_cast %145 : vector<8xf32> to vector<8x1xf32>
    %147 = vector.broadcast %146 : vector<8x1xf32> to vector<8x8xf32>
    %148 = arith.divf %144, %147 : vector<8x8xf32>
    %cst_64 = arith.constant dense<0.000000e+00> : vector<8x16xf32>
    %149 = tpu.matmul %148, %136, %cst_64 {dimension_numbers = #tpu.dot_dimension_numbers<[1], [0], [0], [1], [0, 0, 1, 1], [], []>} : vector<8x8xf32>, vector<8x16xf32>, vector<8x16xf32> -> vector<8x16xf32>
    %150 = arith.truncf %149 : vector<8x16xf32> to vector<8x16xbf16>
    %151 = vector.extract_strided_slice %113 {offsets = [16, 0], sizes = [16, 4], strides = [1, 1]} : vector<32x4xbf16> to vector<16x4xbf16>
    %cst_65 = arith.constant dense<0.000000e+00> : vector<8x4xf32>
    %152 = tpu.matmul %150, %151, %cst_65 {dimension_numbers = #tpu.dot_dimension_numbers<[1], [0], [0], [1], [0, 0, 1, 1], [], []>} : vector<8x16xbf16>, vector<16x4xbf16>, vector<8x4xf32> -> vector<8x4xf32>
    %153 = arith.addf %133, %152 : vector<8x4xf32>
    %c0_66 = arith.constant 0 : index
    %c0_67 = arith.constant 0 : index
    %c0_68 = arith.constant 0 : index
    %154 = vector.load %arg17[%c0_66, %c0_67, %c0_68] : memref<1x8x4xf32, #tpu.memory_space<vmem>>, vector<1x8x4xf32>
    %155 = vector.shape_cast %154 : vector<1x8x4xf32> to vector<8x4xf32>
    %156 = vector.shape_cast %153 : vector<8x4xf32> to vector<1x8x4xf32>
    tpu.vector_store %arg17[%c0_66, %c0_67, %c0_68], %156 {strides = array<i32>} : memref<1x8x4xf32, #tpu.memory_space<vmem>>, vector<1x8x4xf32>,
    %cst_69 = arith.constant dense<0xFF800000> : vector<8xf32>
    %157 = vector.multi_reduction <maximumf>, %153, %cst_69 [1] : vector<8x4xf32> to vector<8xf32>
    %158 = vector.shape_cast %157 : vector<8xf32> to vector<8x1xf32>
    %159 = tpu.iota {dimensions = array<i32: 1>} : vector<8x4xi32>
    %160 = vector.broadcast %158 : vector<8x1xf32> to vector<8x4xf32>
    %161 = arith.cmpf oge, %153, %160 : vector<8x4xf32>
    %c4_i32_70 = arith.constant 4 : i32
    %162 = vector.broadcast %c4_i32_70 : i32 to vector<8x4xi32>
    %163 = arith.select %161, %159, %162 : vector<8x4xi1>, vector<8x4xi32>
    %cst_71 = arith.constant dense<2147483647> : vector<8xi32>
    %164 = vector.multi_reduction <minsi>, %163, %cst_71 [1] : vector<8x4xi32> to vector<8xi32>
    %165 = vector.shape_cast %164 : vector<8xi32> to vector<8x1xi32>
    %c0_72 = arith.constant 0 : index
    %c0_73 = arith.constant 0 : index
    %c0_74 = arith.constant 0 : index
    %166 = vector.load %arg18[%c0_72, %c0_73, %c0_74] : memref<1x8x1xi32, #tpu.memory_space<vmem>>, vector<1x8x1xi32>
    %167 = vector.shape_cast %166 : vector<1x8x1xi32> to vector<8x1xi32>
    %168 = vector.shape_cast %165 : vector<8x1xi32> to vector<1x8x1xi32>
    tpu.vector_store %arg18[%c0_72, %c0_73, %c0_74], %168 {strides = array<i32>} : memref<1x8x1xi32, #tpu.memory_space<vmem>>, vector<1x8x1xi32>,
    return
  }
  func.func @transform_0(%arg0: i32) -> (i32, i32, i32) {
    %c0_i32 = arith.constant 0 : i32
    %c0_i32_0 = arith.constant 0 : i32
    %c0_i32_1 = arith.constant 0 : i32
    return %arg0, %c0_i32, %c0_i32_0 : i32, i32, i32
  }
  func.func @transform_1(%arg0: i32) -> (i32, i32, i32) {
    %c0_i32 = arith.constant 0 : i32
    %c0_i32_0 = arith.constant 0 : i32
    %c0_i32_1 = arith.constant 0 : i32
    return %arg0, %c0_i32, %c0_i32_0 : i32, i32, i32
  }
  func.func @transform_2(%arg0: i32) -> (i32, i32, i32) {
    %c0_i32 = arith.constant 0 : i32
    %c0_i32_0 = arith.constant 0 : i32
    %c0_i32_1 = arith.constant 0 : i32
    return %arg0, %c0_i32, %c0_i32_0 : i32, i32, i32
  }
  func.func @transform_3(%arg0: i32) -> (i32, i32, i32) {
    %c0_i32 = arith.constant 0 : i32
    %c0_i32_0 = arith.constant 0 : i32
    %c0_i32_1 = arith.constant 0 : i32
    return %arg0, %c0_i32, %c0_i32_0 : i32, i32, i32
  }
  func.func @transform_4(%arg0: i32) -> (i32, i32, i32) {
    %c0_i32 = arith.constant 0 : i32
    %c0_i32_0 = arith.constant 0 : i32
    %c0_i32_1 = arith.constant 0 : i32
    return %arg0, %c0_i32, %c0_i32_0 : i32, i32, i32
  }
  func.func @transform_5(%arg0: i32) -> (i32, i32) {
    %c0_i32 = arith.constant 0 : i32
    %c0_i32_0 = arith.constant 0 : i32
    %c0_i32_1 = arith.constant 0 : i32
    return %c0_i32, %c0_i32_0 : i32, i32
  }
  func.func @transform_6(%arg0: i32) -> (i32, i32) {
    %c0_i32 = arith.constant 0 : i32
    %c0_i32_0 = arith.constant 0 : i32
    %c0_i32_1 = arith.constant 0 : i32
    return %c0_i32, %c0_i32_0 : i32, i32
  }
  func.func @transform_7(%arg0: i32) -> (i32, i32) {
    %c0_i32 = arith.constant 0 : i32
    %c0_i32_0 = arith.constant 0 : i32
    %c0_i32_1 = arith.constant 0 : i32
    return %c0_i32, %c0_i32_0 : i32, i32
  }
  func.func @transform_8(%arg0: i32) -> (i32, i32) {
    %c0_i32 = arith.constant 0 : i32
    %c0_i32_0 = arith.constant 0 : i32
    %c0_i32_1 = arith.constant 0 : i32
    return %c0_i32, %c0_i32_0 : i32, i32
  }
  func.func @transform_9(%arg0: i32) -> (i32, i32) {
    %c0_i32 = arith.constant 0 : i32
    %c0_i32_0 = arith.constant 0 : i32
    %c0_i32_1 = arith.constant 0 : i32
    return %c0_i32, %c0_i32_0 : i32, i32
  }
  func.func @transform_10(%arg0: i32) -> (i32, i32) {
    %c0_i32 = arith.constant 0 : i32
    %c0_i32_0 = arith.constant 0 : i32
    %c0_i32_1 = arith.constant 0 : i32
    return %c0_i32, %c0_i32_0 : i32, i32
  }
  func.func @transform_11(%arg0: i32) -> (i32, i32) {
    %c0_i32 = arith.constant 0 : i32
    %c0_i32_0 = arith.constant 0 : i32
    %c0_i32_1 = arith.constant 0 : i32
    return %c0_i32, %c0_i32_0 : i32, i32
  }
  func.func @transform_12(%arg0: i32) -> (i32, i32) {
    %c0_i32 = arith.constant 0 : i32
    %c0_i32_0 = arith.constant 0 : i32
    %c0_i32_1 = arith.constant 0 : i32
    return %c0_i32, %c0_i32_0 : i32, i32
  }
  func.func @transform_13(%arg0: i32) -> (i32, i32) {
    %c0_i32 = arith.constant 0 : i32
    %c0_i32_0 = arith.constant 0 : i32
    %c0_i32_1 = arith.constant 0 : i32
    return %c0_i32, %c0_i32_0 : i32, i32
  }
  func.func @transform_14(%arg0: i32) -> (i32, i32, i32, i32) {
    %c0_i32 = arith.constant 0 : i32
    %c0_i32_0 = arith.constant 0 : i32
    %c0_i32_1 = arith.constant 0 : i32
    %c0_i32_2 = arith.constant 0 : i32
    return %arg0, %c0_i32, %c0_i32_0, %c0_i32_1 : i32, i32, i32, i32
  }
  func.func @transform_15(%arg0: i32) -> (i32, i32, i32) {
    %c0_i32 = arith.constant 0 : i32
    %c0_i32_0 = arith.constant 0 : i32
    %c0_i32_1 = arith.constant 0 : i32
    return %arg0, %c0_i32, %c0_i32_0 : i32, i32, i32
  }
  func.func @transform_16(%arg0: i32) -> (i32, i32, i32) {
    %c0_i32 = arith.constant 0 : i32
    %c0_i32_0 = arith.constant 0 : i32
    %c0_i32_1 = arith.constant 0 : i32
    return %arg0, %c0_i32, %c0_i32_0 : i32, i32, i32
  }
  func.func @transform_17(%arg0: i32) -> (i32, i32, i32) {
    %c0_i32 = arith.constant 0 : i32
    %c0_i32_0 = arith.constant 0 : i32
    %c0_i32_1 = arith.constant 0 : i32
    return %arg0, %c0_i32, %c0_i32_0 : i32, i32, i32
  }
}

</mosaic_0001>

<bundles_post_ra>
// kernel: opinion_mining_forward.2
= control target key start
LH: loop header
LB: loop body
LE: loop exit
PB: predicated region body
PF: predicated region fallthrough
CT: control target
= control target key end

     0   :  { %vm57_vm0 = vcmask 261120   ;;  %vm199_vm1 = vcmask 359424   ;;  %vm238_vm2 = vcmask 39936   ;;  %s490_s1 = inlined_call_operand.vmem [shape: bf16[32,32], index: 1, kind: input, shape index: {}]   ;;  %s491_s2 = inlined_call_operand.vmem [shape: f32[1,32], index: 2, kind: input, shape index: {}]   ;;  %s492_s0 = inlined_call_operand.vmem [shape: bf16[16,32], index: 0, kind: input, shape index: {}]   ;;  %s493_s3 = inlined_call_operand.vmem [shape: bf16[32,428], index: 3, kind: input, shape index: {}]   ;;  %s494_s5 = inlined_call_operand.vmem [shape: bf16[32,5], index: 5, kind: input, shape index: {}]   ;;  %s495_s6 = inlined_call_operand.vmem [shape: f32[1,5], index: 6, kind: input, shape index: {}]   ;;  %s496_s4 = inlined_call_operand.vmem [shape: f32[1,428], index: 4, kind: input, shape index: {}]   ;;  %s497_s8 = inlined_call_operand.vmem [shape: f32[16,128], index: 8, kind: output, shape index: {1}]   ;;  %s498_s9 = inlined_call_operand.vmem [shape: f32[16,300], index: 9, kind: output, shape index: {2}]   ;;  %s499_s7 = inlined_call_operand.vmem [shape: f32[16,5], index: 7, kind: output, shape index: {0}]  }
   0x1   :  { %v313_v0 = vld [vmem:[%s490_s1 + $0x8] sm:$0xff]  ;;  %v312_v1 = vld [vmem:[%s490_s1] sm:$0xff]  ;;  %v320_v4 = vld [vmem:[%s493_s3 + $0x2c] sm:$0xf0] }
   0x2   :  { %67 = vmatpush.bf16.msra.mxu0 %v313_v0  ;;  %v311_v2 = vld [vmem:[%s492_s0] sm:$0xff]  ;;  %v286_v7 = vld [vmem:[%s493_s3 + $0x30] sm:$0xf0]  ;;  %v292_v8 = vld [vmem:[%s493_s3 + $0x28] sm:$0xf] }
   0x3   :  { %v284_v3 = vld [vmem:[%s493_s3 + $0x20] sm:$0xf]  ;;  %v318_v5 = vld [vmem:[%s493_s3 + $0x24] sm:$0xf]  ;;  %v321_v9 = vld [vmem:[%s493_s3 + $0x34] sm:$0xf0] }
   0x4   :  { %v285_v6 = vor.u32 %v320_v4, %v284_v3  ;;  %v289_v10 = vor.u32 %v318_v5, %v286_v7  ;;  %v293_v11 = vor.u32 %v321_v9, %v292_v8  ;;  %v319_v12 = vld [vmem:[%s493_s3 + $0x2c] sm:$0xf]  ;;  %v294_v13 = vld [vmem:[%s493_s3 + $0x38] sm:$0xf0]  ;;  %v268_v15 = vld [vmem:[%s493_s3] sm:$0xf] }
   0x5   :  { %v297_v14 = vor.u32 %v319_v12, %v294_v13  ;;  %v316_v16 = vld [vmem:[%s493_s3 + $0xc] sm:$0xf0]  ;;  %v314_v17 = vld [vmem:[%s493_s3 + $0x4] sm:$0xf]  ;;  %v270_v19 = vld [vmem:[%s493_s3 + $0x10] sm:$0xf0] }
   0x6   :  { %68 = vmatpush.bf16.msra.mxu0 %v312_v1  ;;  %145 = vmatpush.bf16.msra.mxu1 %v285_v6  ;;  %v269_v18 = vor.u32 %v316_v16, %v268_v15  ;;  %v276_v20 = vld [vmem:[%s493_s3 + $0x8] sm:$0xf]  ;;  %v317_v21 = vld [vmem:[%s493_s3 + $0x14] sm:$0xf0]  ;;  %v273_v22 = vor.u32 %v314_v17, %v270_v19  ;;  %v315_v24 = vld [vmem:[%s493_s3 + $0xc] sm:$0xf] }
   0x7   :  { %159 = vmatpush.bf16.msra.mxu2 %v289_v10  ;;  %173 = vmatpush.bf16.msra.mxu3 %v293_v11  ;;  %v277_v23 = vor.u32 %v317_v21, %v276_v20  ;;  %v278_v25 = vld [vmem:[%s493_s3 + $0x18] sm:$0xf0]  ;;  %v323_v27 = vld [vmem:[%s494_s5 + $0x8] sm:$0xff]  ;;  %v322_v28 = vld [vmem:[%s494_s5] sm:$0xff] }
   0x8   :  { %v281_v26 = vor.u32 %v315_v24, %v278_v25  ;;  %v324_v30 = vld [vmem:[%s491_s2] ss:$0 sm:$0xff] }
   0x9   :  { %265 = vmatmul.msk.bf16.vlgmr.msra.gmra.mxu0 %vm57_vm0, %v311_v2  ;;  %v86_v37 = vld [vmem:[%s496_s4] sm:$0xf] }
   0xa   :  { %187 = vmatpush.bf16.msrb.mxu0 %v297_v14  ;;  %146 = vmatpush.bf16.msra.mxu1 %v269_v18  ;;  %v88_v38 = vperm.slane %v86_v37, 0  ;;  %v91_v39 = vperm.slane %v86_v37, 3  ;;  %v89_v44 = vperm.slane %v86_v37, 1  ;;  %v90_v45 = vperm.slane %v86_v37, 2  ;;  %v325_v54 = vld [vmem:[%s495_s6] ss:$0 sm:$0xff] }
   0xb   :  { %160 = vmatpush.bf16.msra.mxu2 %v273_v22  ;;  %174 = vmatpush.bf16.msra.mxu3 %v277_v23 }
   0xe   :  { %188 = vmatpush.bf16.msrb.mxu0 %v281_v26  ;;  %230 = vmatpush.bf16.msrb.mxu1 %v323_v27 }
  0x12   :  { %231 = vmatpush.bf16.msrb.mxu1 %v322_v28 }
  0x86   :  { %v70_v29 = vpop.f32.mrf.mxu0 }
  0x87   :  { %v71_v31 = vadd.f32 %v324_v30, %v70_v29 }
  0x89   :  { %326 = vtanh.f32 %v71_v31 }
  0x8e   :  { %v72_v32 = vpop.f32.mrf.mxu0 }
  0x8f   :  { %v73_v33 = vadd.f32 %v324_v30, %v72_v32  ;;  %v327_v34 = vpop.eup %326 }
  0x91   :  { %328 = vtanh.f32 %v73_v33 }
  0x97   :  { %v329_v35 = vpop.eup %328 }
  0x98   :  { %v77_v36 = vpack.c.bf16 %v329_v35, %v327_v34 }
  0x9a   :  { %298 = vmatmul.msk.bf16.vlgmr.msra.gmra.mxu1 %vm57_vm0, %v77_v36  ;;  %299 = vmatmul.msk.bf16.vlgmr.msra.gmra.mxu2 %vm57_vm0, %v77_v36 }
  0x9b   :  { %300 = vmatmul.msk.bf16.vlgmr.msra.gmra.mxu3 %vm57_vm0, %v77_v36  ;;  %301 = vmatmul.msk.bf16.vlgmr.msrb.gmra.mxu0 %vm57_vm0, %v77_v36 }
  0xaa   :  { %310 = vmatmul.msk.bf16.vlgmr.msrb.gmra.mxu1 %vm57_vm0, %v77_v36 }
 0x117   :  { %v148_v40 = vpop.f32.mrf.mxu1 }
 0x118   :  { %v149_v41 = vadd.f32 %v148_v40, %v88_v38  ;;  %v190_v42 = vpop.f32.mrf.mxu0 }
 0x119   :  { %v191_v43 = vadd.f32 %v190_v42, %v91_v39 }
 0x11a   :  { %195 = vst [vmem:[%s497_s8] sm:$0xff] %v149_v41 }
 0x11b   :  { %200 = vst.msk [vmem:[%s498_s9 + $0x10] sm:$0xff] %vm199_vm1, %v191_v43 }
 0x11d   :  { %v162_v46 = vpop.f32.mrf.mxu2 }
 0x11e   :  { %v163_v47 = vadd.f32 %v162_v46, %v89_v44  ;;  %v176_v48 = vpop.f32.mrf.mxu3 }
 0x11f   :  { %v177_v49 = vadd.f32 %v176_v48, %v90_v45  ;;  %v150_v50 = vpop.f32.mrf.mxu1 }
 0x120   :  { %197 = vst [vmem:[%s498_s9] sm:$0xff] %v163_v47  ;;  %v151_v51 = vadd.f32 %v150_v50, %v88_v38  ;;  %v192_v52 = vpop.f32.mrf.mxu0 }
 0x121   :  { %198 = vst [vmem:[%s498_s9 + $0x8] sm:$0xff] %v177_v49  ;;  %v193_v53 = vadd.f32 %v192_v52, %v91_v39 }
 0x122   :  { %196 = vst [vmem:[%s497_s8 + $0x8] sm:$0xff] %v151_v51 }
 0x123   :  { %203 = vst.msk [vmem:[%s498_s9 + $0x28] sm:$0xff] %vm199_vm1, %v193_v53 }
 0x125   :  { %v164_v55 = vpop.f32.mrf.mxu2 }
 0x126   :  { %v165_v56 = vadd.f32 %v164_v55, %v89_v44  ;;  %v178_v57 = vpop.f32.mrf.mxu3 }
 0x127   :  { %v179_v58 = vadd.f32 %v178_v57, %v90_v45  ;;  %v233_v59 = vpop.f32.mrf.mxu1 }
 0x128   :  { %201 = vst [vmem:[%s498_s9 + $0x18] sm:$0xff] %v165_v56  ;;  %v234_v60 = vadd.f32 %v325_v54, %v233_v59 }
 0x129   :  { %202 = vst [vmem:[%s498_s9 + $0x20] sm:$0xff] %v179_v58 }
 0x12a   :  { %239 = vst.msk [vmem:[%s499_s7] sm:$0xff] %vm238_vm2, %v234_v60 }
 0x12f   :  { %v235_v61 = vpop.f32.mrf.mxu1 }
 0x130   :  { %v236_v62 = vadd.f32 %v325_v54, %v235_v61 }
 0x132   :  { %240 = vst.msk [vmem:[%s499_s7 + $0x8] sm:$0xff] %vm238_vm2, %v236_v62 }

// kernel: opinion_mining_forward.3
= control target key start
LH: loop header
LB: loop body
LE: loop exit
PB: predicated region body
PF: predicated region fallthrough
CT: control target
= control target key end

     0   :  { %s4299_s0 = inlined_call_operand.vmem [shape: f32[2,8,8], index: 0, kind: input, shape index: {}]   ;;  %s4300_s1 = inlined_call_operand.vmem [shape: f32[2,8,32], index: 1, kind: input, shape index: {}]   ;;  %s4301_s2 = inlined_call_operand.vmem [shape: f32[2,8,128], index: 2, kind: input, shape index: {}]   ;;  %s4302_s3 = inlined_call_operand.vmem [shape: f32[2,8,300], index: 3, kind: input, shape index: {}]   ;;  %s4303_s4 = inlined_call_operand.vmem [shape: s32[2,8,8], index: 4, kind: input, shape index: {}]   ;;  %s4304_s5 = inlined_call_operand.vmem [shape: bf16[32,4], index: 5, kind: input, shape index: {}]   ;;  %s4305_s6 = inlined_call_operand.vmem [shape: f32[1,4], index: 6, kind: input, shape index: {}]   ;;  %s4306_s7 = inlined_call_operand.vmem [shape: bf16[32,32], index: 7, kind: input, shape index: {}]   ;;  %s4307_s8 = inlined_call_operand.vmem [shape: bf16[300,32], index: 8, kind: input, shape index: {}]   ;;  %s4308_s9 = inlined_call_operand.vmem [shape: f32[1,32], index: 9, kind: input, shape index: {}]   ;;  %s4309_s10 = inlined_call_operand.vmem [shape: bf16[32,4], index: 10, kind: input, shape index: {}]   ;;  %s4310_s11 = inlined_call_operand.vmem [shape: bf16[300,4], index: 11, kind: input, shape index: {}]   ;;  %s4311_s12 = inlined_call_operand.vmem [shape: bf16[32,4], index: 12, kind: input, shape index: {}]   ;;  %s4312_s13 = inlined_call_operand.vmem [shape: f32[1,4], index: 13, kind: input, shape index: {}]   ;;  %s4313_s14 = inlined_call_operand.vmem [shape: f32[2,8,8,4], index: 14, kind: output, shape index: {0}]   ;;  %s4314_s15 = inlined_call_operand.hbm [shape: s32[2,8,8], index: 15, kind: output, shape index: {1}]   ;;  %s4315_s16 = inlined_call_operand.vmem [shape: f32[2,8,4], index: 16, kind: output, shape index: {2}]   ;;  %s4316_s17 = inlined_call_operand.vmem [shape: s32[2,8,1], index: 17, kind: output, shape index: {3}]  }
   0x1   :  { %4333 = sst [smem:[#allocation11_spill]] %s4299_s0 }
   0x2   :  { %4334 = sst [smem:[#allocation12_spill]] %s4300_s1 }
   0x3   :  { %4335 = sst [smem:[#allocation13_spill]] %s4301_s2 }
   0x4   :  { %23 = vsyncpa [#allocation3], 0 }
   0x5   :  { %25 = vsyncpa [#allocation3 + $0x1], 0  ;;  %s3331_s24 = smov 0   ;;  %s3333_s25 = smov 0  }
   0x6   :  { %s3335_s26 = smov 0   ;;  %s3337_s27 = smov 0  }
   0x7 LB: > { %4336 = sst [smem:[#allocation5_spill]] %s3218_s24  ;;  %s3352_s28 = sadd.s32 4294967295, %s3230_s27   ;;  %s3230_s27 = sphi %s3337_s27, %s4397_s27   ;;  %s3226_s26 = sphi %s3335_s26, %s4402_s26   ;;  %s3222_s25 = sphi %s3333_s25, %s4401_s25   ;;  %s3218_s24 = sphi %s3331_s24, %s4400_s24  }
   0x8   : > { %4337 = sst [smem:[#allocation6_spill]] %s3226_s26  ;;  %s2791_s29 = sadd.s32 4294967294, %s3230_s27  }
   0x9   : > { %4338 = sst [smem:[#allocation7_spill]] %s3230_s27  ;;  %s3356_s0 = sadd.s32 1, %s3230_s27  }
   0xa   : > { %4339 = sst [smem:[#allocation8_spill]] %s3356_s0  ;;  %s383_s30 = sadd.s32 1, %s3226_s26 }
   0xb   : > { %s380_s18 = ssub.s32 %s3230_s27, %s3356_s0  ;;  %p393_p0 = scmp.ne.s32.totalorder %s3226_s26, %s3222_s25 }
   0xc   : > { %p381_p1 = scmp.eq.s32.totalorder %s380_s18, 0  ;;  %p394_p2 = scmp.eq.s32.totalorder %s3352_s28, 1 }
   0xd   : > { %p399_p3 = scmp.ne.s32.totalorder %s3222_s25, %s3218_s24  ;;  %p400_p4 = scmp.eq.s32.totalorder %s2791_s29, 1 }
   0xe   : > { %s3367_s19 = scalar_select %p381_p1, %s3226_s26, %s383_s30  }
   0xf   : > { %p3369_p5 = por %p394_p2, %p393_p0  ;;  %p3373_p6 = por %p400_p4, %p399_p3 }
  0x10   : > { %4340 = sst [smem:[#allocation9_spill]] %s3367_s19  ;;  %p2794_p7 = scmp.ge.s32.totalorder %s3230_s27, 1 }
  0x11   : > { %s4342_s20 = scalar_select %p3373_p6, 1, 0 }
  0x12   : > { %p533_p8 = scmp.lt.s32.totalorder %s3230_s27, 3 }
  0x13   : > { %4343 = sst [smem:[#allocation10_spill]] %s4342_s20 }
  0x14   : > { %p534_p9 = pnand %p2794_p7, %p533_p8 }
  0x15   : > { %p614_p10 = scmp.lt.s32.totalorder (!%p534_p9), %s3352_s28, 1  ;;  %s4344_s2 = sld [smem:[#allocation13_spill]] (!%p534_p9) }
  0x16   : > { %537 = sbr.rel (%p534_p9) target bundleno = 2871 (0xb37), region = 76  ;;  %s3232_s18 = smov (!%p534_p9), 96  }
  0x17   : > { %s4345_s0 = sld [smem:[#allocation11_spill]] (!%p534_p9)  ;;  %s3236_s23 = smov (!%p534_p9), 64  }
  0x18   : > { %s4346_s26 = sld [smem:[#allocation12_spill]] (!%p534_p9)  ;;  %s3237_s29 = smov (!%p534_p9), 48  }
  0x1b   : > { %s3381_s21 = scalar_select %p614_p10, %s3352_s28, 1  ;;  %vm4325_vm0 = vcmask 64512   ;;  %v3032_v3 = vld [vmem:[%s4304_s5 + $0x8] sm:$0xff]  ;;  %v3031_v4 = vld [vmem:[%s4304_s5] sm:$0xff]  ;;  %vm4324_vm1 = vcmask 261120   ;;  %v819_v27 = vlaneseq  ;;  %vm4323_vm2 = vcmask 31744  }
  0x1c   : > { %763 = vmatpush.bf16.msra.mxu1 %v3032_v3  ;;  %v3154_v53 = vld [vmem:[%s4305_s6] ss:$0 sm:$0xff] }
  0x1d   : > { %s3384_s22 = sshll.u32 %s3381_s21, 3  ;;  %v3426_v30 = vshrl.u32 %v819_v27, 7  ;;  %s3030_s19 = sshll.u32 %s3381_s21, 6 }
  0x1e   : > { %s3390_s30 = scalar_lea.vmem %s4344_s2, %s3384_s22  ;;  %s617_s20 = scalar_lea.vmem %s4345_s0, %s3384_s22 }
  0x1f   : > { %v3393_v0 = vld [vmem:[%s3390_s30] sm:$0xff]  ;;  %s621_s0 = scalar_lea.vmem %s4346_s26, %s3384_s22  ;;  %s634_s27 = scalar_lea.vmem %s4303_s4, %s3384_s22  ;;  %3126 = vset.pattern.permute.xlu2 %v3426_v30  ;;  %3128 = vset.pattern.permute.xlu1 %v3426_v30 }
  0x20   : > { %653 = vrot.lane.b32.xlu0 %v3393_v0, %s3232_s18  ;;  %v650_v1 = vld [vmem:[%s617_s20] sm:$0xff]  ;;  %764 = vmatpush.bf16.msra.mxu1 %v3031_v4  ;;  %s3450_s26 = scalar_lea.vmem %s4313_s14, %s3030_s19  ;;  %s3238_s19 = smov 112  }
  0x21   : > { %v651_v5 = vld [vmem:[%s621_s0] sm:$0xff]  ;;  %3127 = vset.pattern.permute.xlu0 %v3426_v30  ;;  %s3077_s0 = smul.u32 24, %s3381_s21  ;;  %s3239_s20 = smov 32  }
  0x22   : > { %v957_v31 = vld [vmem:[%s634_s27] sm:$0xff] }
  0x23   : > { %v958_v34 = vperm.slane %v957_v31, 0  ;;  %v972_v35 = vperm.slane %v957_v31, 2  ;;  %v965_v36 = vperm.slane %v957_v31, 1  ;;  %v979_v42 = vperm.slane %v957_v31, 3  ;;  %s630_s27 = scalar_lea.vmem %s4302_s3, %s3077_s0 }
  0x24   : > { %v1000_v43 = vperm.slane %v957_v31, 6  ;;  %v986_v48 = vperm.slane %v957_v31, 4  ;;  %v993_v52 = vperm.slane %v957_v31, 5  ;;  %v1007_v63 = vperm.slane %v957_v31, 7 }
  0x27   : > { %963 = vperm.xlu2 %3126, %v958_v34   ;;  %977 = vperm.xlu1 %3128, %v972_v35  }
  0x29   : > { %970 = vperm.xlu0 %3127, %v965_v36  }
  0x2f   : > { %984 = vperm.xlu2 %3126, %v979_v42   ;;  %1005 = vperm.xlu1 %3128, %v1000_v43  }
  0x37   : > { %991 = vperm.xlu2 %3126, %v986_v48  }
  0x3f   : > { %998 = vperm.xlu2 %3126, %v993_v52  }
  0x92   : > { %v654_v2 = vpop.permute.xlu0 %653 }
  0x93   : > { %675 = vmatpush.msra.mxu0 %v654_v2 }
  0x94   : > { %2805 = vmatmul.msk.f32.vlgmr.msra.gmra.mxu0 %vm4325_vm0, %v650_v1 }
 0x111   : > { %v677_v6 = vpop.f32.mrf.mxu0 }
 0x112   : > { %v3411_v7 = vadd.f32 %v677_v6, %v651_v5 }
 0x114   : > { %v681_v8 = vrot.slane %v3411_v7, 1  ;;  %v688_v9 = vperm.slane %v3411_v7, 0  ;;  %v682_v16 = vrot.slane %v3411_v7, 2  ;;  %v683_v17 = vrot.slane %v3411_v7, 3 }
 0x115   : > { %v684_v25 = vrot.slane %v3411_v7, 4  ;;  %v685_v26 = vrot.slane %v3411_v7, 5  ;;  %v686_v40 = vrot.slane %v3411_v7, 6  ;;  %v687_v41 = vrot.slane %v3411_v7, 7 }
 0x116   : > { %v689_v10 = vperm.slane %v681_v8, 0  ;;  %v704_v11 = vadd.f32 %v688_v9, %v3393_v0  ;;  %v690_v18 = vperm.slane %v682_v16, 0  ;;  %v691_v19 = vperm.slane %v683_v17, 0  ;;  %v3480_v16 = vpop.permute.xlu2 %963  ;;  %v3482_v17 = vpop.permute.xlu1 %977 }
 0x117   : > { %v692_v28 = vperm.slane %v684_v25, 0  ;;  %v693_v29 = vperm.slane %v685_v26, 0  ;;  %v694_v44 = vperm.slane %v686_v40, 0  ;;  %v695_v45 = vperm.slane %v687_v41, 0 }
 0x118   : > { %v705_v12 = vadd.f32 %v689_v10, %v3393_v0  ;;  %v712_v13 = vmax.f32 %v704_v11, 0.0  ;;  %v706_v20 = vadd.f32 %v690_v18, %v3393_v0  ;;  %v707_v21 = vadd.f32 %v691_v19, %v3393_v0  ;;  %v3484_v18 = vpop.permute.xlu0 %970 }
 0x119   : > { %v708_v32 = vadd.f32 %v692_v28, %v3393_v0  ;;  %v709_v33 = vadd.f32 %v693_v29, %v3393_v0  ;;  %v710_v46 = vadd.f32 %v694_v44, %v3393_v0  ;;  %v711_v47 = vadd.f32 %v695_v45, %v3393_v0 }
 0x11a   : > { %v713_v14 = vmax.f32 %v705_v12, 0.0  ;;  %v714_v22 = vmax.f32 %v706_v20, 0.0  ;;  %v715_v23 = vmax.f32 %v707_v21, 0.0  ;;  %v3489_v20 = vand.u32 127, %v819_v27 }
 0x11b   : > { %v716_v37 = vmax.f32 %v708_v32, 0.0  ;;  %v717_v38 = vmax.f32 %v709_v33, 0.0  ;;  %v718_v49 = vmax.f32 %v710_v46, 0.0  ;;  %v719_v50 = vmax.f32 %v711_v47, 0.0 }
 0x11c   : > { %v720_v15 = vpack.c.bf16 %v713_v14, %v712_v13  ;;  %v721_v24 = vpack.c.bf16 %v715_v23, %v714_v22 }
 0x11d   : > { %v722_v39 = vpack.c.bf16 %v717_v38, %v716_v37  ;;  %v723_v51 = vpack.c.bf16 %v719_v50, %v718_v49 }
 0x11e   : > { %2814 = vmatmul.msk.bf16.vlgmr.msra.gmra.mxu1 %vm4324_vm1, %v720_v15  ;;  %v3486_v19 = vpop.permute.xlu2 %984  ;;  %v3491_v21 = vpop.permute.xlu1 %1005 }
 0x126   : > { %v3495_v26 = vpop.permute.xlu2 %991 }
 0x12e   : > { %2815 = vmatmul.msk.bf16.gmra.mxu1 %vm4324_vm1, %v721_v24  ;;  %v3499_v34 = vpop.permute.xlu2 %998 }
 0x13e   : > { %2816 = vmatmul.msk.bf16.gmra.mxu1 %vm4324_vm1, %v722_v39 }
 0x14e   : > { %2817 = vmatmul.msk.bf16.gmra.mxu1 %vm4324_vm1, %v723_v51 }
 0x19b   : > { %v766_v54 = vpop.f32.mrf.mxu1 }
 0x19c   : > { %v767_v55 = vadd.f32 %v3154_v53, %v766_v54 }
 0x19e   : > { %787 = vst.msk [vmem:[%s3450_s26] sm:$0xff] %vm4323_vm2, %v767_v55  ;;  %v795_v56 = vsel %vm4323_vm2, %v767_v55, -inf }
 0x19f   : > { %796 = vmax.xlane.f32.xlu0 %v795_v56 }
 0x1a3   : > { %v768_v57 = vpop.f32.mrf.mxu1 }
 0x1a4   : > { %v769_v58 = vadd.f32 %v3154_v53, %v768_v57 }
 0x1a6   : > { %788 = vst.msk [vmem:[%s3450_s26 + $0x8] sm:$0xff] %vm4323_vm2, %v769_v58  ;;  %v798_v59 = vsel %vm4323_vm2, %v769_v58, -inf }
 0x1a7   : > { %799 = vmax.xlane.f32.xlu1 %v798_v59 }
 0x1ab   : > { %v771_v60 = vpop.f32.mrf.mxu1 }
 0x1ac   : > { %v772_v61 = vadd.f32 %v3154_v53, %v771_v60 }
 0x1ae   : > { %789 = vst.msk [vmem:[%s3450_s26 + $0x10] sm:$0xff] %vm4323_vm2, %v772_v61  ;;  %v801_v62 = vsel %vm4323_vm2, %v772_v61, -inf }
 0x1af   : > { %802 = vmax.xlane.f32.xlu1 %v801_v62 }
 0x1b3   : > { %v773_v0 = vpop.f32.mrf.mxu1  ;;  %1012 = vperm.xlu0 %3127, %v1007_v63  }
 0x1b4   : > { %v774_v1 = vadd.f32 %v3154_v53, %v773_v0 }
 0x1b6   : > { %790 = vst.msk [vmem:[%s3450_s26 + $0x18] sm:$0xff] %vm4323_vm2, %v774_v1  ;;  %v804_v2 = vsel %vm4323_vm2, %v774_v1, -inf }
 0x1b7   : > { %805 = vmax.xlane.f32.xlu2 %v804_v2 }
 0x1bb   : > { %v776_v3 = vpop.f32.mrf.mxu1 }
 0x1bc   : > { %v777_v4 = vadd.f32 %v3154_v53, %v776_v3 }
 0x1be   : > { %791 = vst.msk [vmem:[%s3450_s26 + $0x20] sm:$0xff] %vm4323_vm2, %v777_v4  ;;  %v807_v5 = vsel %vm4323_vm2, %v777_v4, -inf }
 0x1bf   : > { %808 = vmax.xlane.f32.xlu2 %v807_v5 }
 0x1c3   : > { %v778_v6 = vpop.f32.mrf.mxu1 }
 0x1c4   : > { %v779_v8 = vadd.f32 %v3154_v53, %v778_v6 }
 0x1c6   : > { %792 = vst.msk [vmem:[%s3450_s26 + $0x28] sm:$0xff] %vm4323_vm2, %v779_v8  ;;  %v810_v9 = vsel %vm4323_vm2, %v779_v8, -inf }
 0x1c7   : > { %811 = vmax.xlane.f32.xlu1 %v810_v9 }
 0x1cb   : > { %v781_v10 = vpop.f32.mrf.mxu1 }
 0x1cc   : > { %v782_v11 = vadd.f32 %v3154_v53, %v781_v10 }
 0x1ce   : > { %793 = vst.msk [vmem:[%s3450_s26 + $0x30] sm:$0xff] %vm4323_vm2, %v782_v11  ;;  %v813_v12 = vsel %vm4323_vm2, %v782_v11, -inf }
 0x1cf   : > { %814 = vmax.xlane.f32.xlu2 %v813_v12 }
 0x1d3   : > { %v783_v13 = vpop.f32.mrf.mxu1 }
 0x1d4   : > { %v3473_v14 = vadd.f32 %v3154_v53, %v783_v13 }
 0x1d6   : > { %794 = vst.msk [vmem:[%s3450_s26 + $0x38] sm:$0xff] %vm4323_vm2, %v3473_v14  ;;  %v816_v15 = vsel %vm4323_vm2, %v3473_v14, -inf }
 0x1d7   : > { %817 = vmax.xlane.f32.xlu1 %v816_v15 }
 0x212   : > { %v797_v22 = vpop.xlane.xlu0 %796 }
 0x213   : > { %vm821_vm3 = vcmp.ge.f32.partialorder %v767_v55, %v797_v22 }
 0x214   : > { %v829_v23 = vsel %vm821_vm3, %v3489_v20, 4 }
 0x215   : > { %v837_v24 = vsel %vm4323_vm2, %v829_v23, 2147483647 }
 0x216   : > { %v839_v25 = vshra.s32 %v837_v24, 16 }
 0x218   : > { %v841_v28 = vcvt.s32.f32 %v839_v25 }
 0x21a   : > { %v800_v29 = vpop.xlane.xlu1 %799  ;;  %842 = vmin.xlane.f32.xlu2 %v841_v28 }
 0x21b   : > { %vm822_vm4 = vcmp.ge.f32.partialorder %v769_v58, %v800_v29 }
 0x21c   : > { %v830_v31 = vsel %vm822_vm4, %v3489_v20, 4 }
 0x21d   : > { %v852_v27 = vsel %vm4323_vm2, %v830_v31, 2147483647 }
 0x21e   : > { %v854_v32 = vshra.s32 %v852_v27, 16  ;;  %v853_v5 = vand.u32 65535, %v852_v27 }
 0x220   : > { %v856_v33 = vcvt.s32.f32 %v854_v32 }
 0x222   : > { %857 = vmin.xlane.f32.xlu1 %v856_v33  ;;  %v803_v35 = vpop.xlane.xlu1 %802 }
 0x223   : > { %vm823_vm5 = vcmp.ge.f32.partialorder %v772_v61, %v803_v35 }
 0x224   : > { %v831_v36 = vsel %vm823_vm5, %v3489_v20, 4 }
 0x225   : > { %v867_v37 = vsel %vm4323_vm2, %v831_v36, 2147483647  ;;  %v3526_v36 = vpop.permute.xlu0 %1012 }
 0x226   : > { %v869_v38 = vshra.s32 %v867_v37, 16  ;;  %v868_v10 = vand.u32 65535, %v867_v37 }
 0x228   : > { %v871_v39 = vcvt.s32.f32 %v869_v38  ;;  %v870_v12 = vcvt.s32.f32 %v868_v10 }
 0x22a   : > { %v806_v40 = vpop.xlane.xlu2 %805  ;;  %872 = vmin.xlane.f32.xlu2 %v871_v39 }
 0x22b   : > { %vm824_vm6 = vcmp.ge.f32.partialorder %v774_v1, %v806_v40  ;;  %v838_v1 = vand.u32 65535, %v837_v24 }
 0x22c   : > { %v832_v41 = vsel %vm824_vm6, %v3489_v20, 4 }
 0x22d   : > { %v882_v42 = vsel %vm4323_vm2, %v832_v41, 2147483647  ;;  %v840_v3 = vcvt.s32.f32 %v838_v1 }
 0x22e   : > { %v884_v43 = vshra.s32 %v882_v42, 16 }
 0x230   : > { %v886_v44 = vcvt.s32.f32 %v884_v43 }
 0x232   : > { %v809_v45 = vpop.xlane.xlu2 %808  ;;  %887 = vmin.xlane.f32.xlu1 %v886_v44 }
 0x233   : > { %vm825_vm7 = vcmp.ge.f32.partialorder %v777_v4, %v809_v45 }
 0x234   : > { %v833_v46 = vsel %vm825_vm7, %v3489_v20, 4 }
 0x235   : > { %v897_v47 = vsel %vm4323_vm2, %v833_v46, 2147483647 }
 0x236   : > { %v899_v48 = vshra.s32 %v897_v47, 16  ;;  %v898_v24 = vand.u32 65535, %v897_v47 }
 0x238   : > { %v901_v49 = vcvt.s32.f32 %v899_v48 }
 0x23a   : > { %v812_v50 = vpop.xlane.xlu1 %811  ;;  %902 = vmin.xlane.f32.xlu2 %v901_v49 }
 0x23b   : > { %vm826_vm8 = vcmp.ge.f32.partialorder %v779_v8, %v812_v50  ;;  %v855_v8 = vcvt.s32.f32 %v853_v5 }
 0x23c   : > { %v834_v51 = vsel %vm826_vm8, %v3489_v20, 4 }
 0x23d   : > { %v912_v52 = vsel %vm4323_vm2, %v834_v51, 2147483647 }
 0x23e   : > { %v914_v53 = vshra.s32 %v912_v52, 16  ;;  %v913_v31 = vand.u32 65535, %v912_v52 }
 0x240   : > { %v916_v54 = vcvt.s32.f32 %v914_v53  ;;  %v915_v32 = vcvt.s32.f32 %v913_v31 }
 0x242   : > { %v815_v55 = vpop.xlane.xlu2 %814  ;;  %917 = vmin.xlane.f32.xlu1 %v916_v54 }
 0x243   : > { %vm827_vm9 = vcmp.ge.f32.partialorder %v782_v11, %v815_v55 }
 0x244   : > { %v835_v56 = vsel %vm827_vm9, %v3489_v20, 4 }
 0x245   : > { %v927_v57 = vsel %vm4323_vm2, %v835_v56, 2147483647 }
 0x246   : > { %v929_v58 = vshra.s32 %v927_v57, 16  ;;  %v928_v35 = vand.u32 65535, %v927_v57 }
 0x248   : > { %v931_v59 = vcvt.s32.f32 %v929_v58  ;;  %v930_v38 = vcvt.s32.f32 %v928_v35 }
 0x24a   : > { %v818_v60 = vpop.xlane.xlu1 %817  ;;  %932 = vmin.xlane.f32.xlu2 %v931_v59 }
 0x24b   : > { %vm828_vm10 = vcmp.ge.f32.partialorder %v3473_v14, %v818_v60  ;;  %v883_v14 = vand.u32 65535, %v882_v42 }
 0x24c   : > { %v836_v61 = vsel %vm828_vm10, %v3489_v20, 4 }
 0x24d   : > { %v942_v62 = vsel %vm4323_vm2, %v836_v61, 2147483647  ;;  %v885_v22 = vcvt.s32.f32 %v883_v14  ;;  %vm4327_vm2 = vcmask 1043459  }
 0x24e   : > { %v944_v63 = vshra.s32 %v942_v62, 16  ;;  %v943_v40 = vand.u32 65535, %v942_v62 }
 0x250   : > { %v946_v0 = vcvt.s32.f32 %v944_v63  ;;  %v945_v42 = vcvt.s32.f32 %v943_v40 }
 0x252   : > { %947 = vmin.xlane.f32.xlu0 %v946_v0 }
 0x28d   : > { %v843_v2 = vpop.xlane.xlu2 %842 }
 0x28e   : > { %vm844_vm11 = vcmp.eq.f32.partialorder %v841_v28, %v843_v2  ;;  %v900_v28 = vcvt.s32.f32 %v898_v24  ;;  %v849_v45 = vcvt.f32.s32 %v843_v2 }
 0x28f   : > { %v845_v4 = vsel %vm844_vm11, %v840_v3, inf }
 0x290   : > { %846 = vmin.xlane.f32.xlu1 %v845_v4  ;;  %v850_v47 = vshll.u32 %v849_v45, 16 }
 0x295   : > { %v858_v6 = vpop.xlane.xlu1 %857 }
 0x296   : > { %vm859_vm12 = vcmp.eq.f32.partialorder %v856_v33, %v858_v6  ;;  %v864_v50 = vcvt.f32.s32 %v858_v6 }
 0x297   : > { %v860_v9 = vsel %vm859_vm12, %v855_v8, inf }
 0x298   : > { %861 = vmin.xlane.f32.xlu2 %v860_v9  ;;  %v865_v55 = vshll.u32 %v864_v50, 16 }
 0x29d   : > { %v3514_v11 = vpop.xlane.xlu2 %872 }
 0x29e   : > { %vm874_vm13 = vcmp.eq.f32.partialorder %v871_v39, %v3514_v11  ;;  %v879_v58 = vcvt.f32.s32 %v3514_v11 }
 0x29f   : > { %v875_v13 = vsel %vm874_vm13, %v870_v12, inf }
 0x2a0   : > { %876 = vmin.xlane.f32.xlu0 %v875_v13  ;;  %v880_v62 = vshll.u32 %v879_v58, 16 }
 0x2a5   : > { %v3517_v15 = vpop.xlane.xlu1 %887 }
 0x2a6   : > { %vm889_vm14 = vcmp.eq.f32.partialorder %v886_v44, %v3517_v15  ;;  %v3233_v44 = vmov 0   ;;  %v894_v1 = vcvt.f32.s32 %v3517_v15 }
 0x2a7   : > { %v890_v23 = vsel %vm889_vm14, %v885_v22, inf  ;;  %3129 = vset.pattern.permute.xlu2 %v3233_v44  ;;  %3130 = vset.pattern.permute.xlu0 %v3233_v44 }
 0x2a8   : > { %891 = vmin.xlane.f32.xlu1 %v890_v23  ;;  %v895_v5 = vshll.u32 %v894_v1, 16 }
 0x2a9   : > { %3131 = vset.pattern.permute.xlu1 %v3233_v44 }
 0x2ad   : > { %v3520_v25 = vpop.xlane.xlu2 %902 }
 0x2ae   : > { %vm904_vm15 = vcmp.eq.f32.partialorder %v901_v49, %v3520_v25  ;;  %v909_v9 = vcvt.f32.s32 %v3520_v25 }
 0x2af   : > { %v905_v29 = vsel %vm904_vm15, %v900_v28, inf }
 0x2b0   : > { %906 = vmin.xlane.f32.xlu2 %v905_v29  ;;  %v910_v13 = vshll.u32 %v909_v9, 16 }
 0x2b5   : > { %v3523_v27 = vpop.xlane.xlu1 %917 }
 0x2b6   : > { %vm919_vm3 = vcmp.eq.f32.partialorder %v916_v54, %v3523_v27  ;;  %v924_v22 = vcvt.f32.s32 %v3523_v27 }
 0x2b7   : > { %v920_v33 = vsel %vm919_vm3, %v915_v32, inf }
 0x2b8   : > { %921 = vmin.xlane.f32.xlu0 %v920_v33  ;;  %v925_v28 = vshll.u32 %v924_v22, 16 }
 0x2bd   : > { %v3528_v37 = vpop.xlane.xlu2 %932 }
 0x2be   : > { %vm934_vm4 = vcmp.eq.f32.partialorder %v931_v59, %v3528_v37  ;;  %v939_v32 = vcvt.f32.s32 %v3528_v37 }
 0x2bf   : > { %v935_v39 = vsel %vm934_vm4, %v930_v38, inf }
 0x2c0   : > { %936 = vmin.xlane.f32.xlu1 %v935_v39  ;;  %v940_v38 = vshll.u32 %v939_v32, 16 }
 0x2c5   : > { %v3531_v41 = vpop.xlane.xlu0 %947 }
 0x2c6   : > { %vm949_vm5 = vcmp.eq.f32.partialorder %v946_v0, %v3531_v41 }
 0x2c7   : > { %v950_v43 = vsel %vm949_vm5, %v945_v42, inf  ;;  %v954_v42 = vcvt.f32.s32 %v3531_v41 }
 0x2c8   : > { %951 = vmin.xlane.f32.xlu1 %v950_v43 }
 0x303   : > { %v847_v46 = vpop.xlane.xlu1 %846 }
 0x304   : > { %v848_v48 = vcvt.f32.s32 %v847_v46  ;;  %v955_v46 = vshll.u32 %v954_v42, 16 }
 0x306   : > { %v851_v49 = vadd.s32 %v850_v47, %v848_v48 }
 0x308   : > { %v3538_v51 = vmul.u32 %v3480_v16, %v851_v49 }
 0x30a   : > { %vm1328_vm6 = vcmp.lt.s32.totalorder %v3538_v51, 2  ;;  %vm1072_vm7 = vcmp.eq.s32.totalorder %v3538_v51, 2 }
 0x30b   : > { %v862_v52 = vpop.xlane.xlu2 %861  ;;  %v1352_v53 = vsel %vm1328_vm6, 1, %v3233_v44  ;;  %v1096_v54 = vsel %vm1072_vm7, 1, %v3233_v44 }
 0x30c   : > { %v863_v56 = vcvt.f32.s32 %v862_v52  ;;  %1361 = vperm.xlu0 %3130, %v1352_v53   ;;  %1105 = vperm.xlu2 %3129, %v1096_v54  }
 0x30e   : > { %v866_v57 = vadd.s32 %v865_v55, %v863_v56 }
 0x310   : > { %v3546_v59 = vmul.u32 %v3484_v18, %v866_v57 }
 0x312   : > { %vm1329_vm8 = vcmp.lt.s32.totalorder %v3546_v59, 2  ;;  %vm1073_vm9 = vcmp.eq.s32.totalorder %v3546_v59, 2 }
 0x313   : > { %v877_v16 = vpop.xlane.xlu0 %876  ;;  %v1353_v60 = vsel %vm1329_vm8, 1, %v3233_v44  ;;  %v1097_v61 = vsel %vm1073_vm9, 1, %v3233_v44  ;;  %vm3602_vm9 = vcmp.le.s32.totalorder %v3489_v20, %v3426_v30 }
 0x314   : > { %v878_v63 = vcvt.f32.s32 %v877_v16  ;;  %1364 = vperm.xlu2 %3129, %v1353_v60   ;;  %1108 = vperm.xlu1 %3131, %v1097_v61  }
 0x316   : > { %v881_v0 = vadd.s32 %v880_v62, %v878_v63 }
 0x318   : > { %v3554_v2 = vmul.u32 %v3482_v17, %v881_v0 }
 0x31a   : > { %vm1330_vm10 = vcmp.lt.s32.totalorder %v3554_v2, 2  ;;  %vm1074_vm11 = vcmp.eq.s32.totalorder %v3554_v2, 2 }
 0x31b   : > { %v892_v18 = vpop.xlane.xlu1 %891  ;;  %v1354_v3 = vsel %vm1330_vm10, 1, %v3233_v44  ;;  %v1098_v4 = vsel %vm1074_vm11, 1, %v3233_v44 }
 0x31c   : > { %v893_v6 = vcvt.f32.s32 %v892_v18  ;;  %1367 = vperm.xlu2 %3129, %v1354_v3   ;;  %1111 = vperm.xlu1 %3131, %v1098_v4  }
 0x31e   : > { %v896_v8 = vadd.s32 %v895_v5, %v893_v6 }
 0x320   : > { %v3562_v10 = vmul.u32 %v3486_v19, %v896_v8 }
 0x322   : > { %vm1331_vm12 = vcmp.lt.s32.totalorder %v3562_v10, 2  ;;  %vm1075_vm13 = vcmp.eq.s32.totalorder %v3562_v10, 2 }
 0x323   : > { %v907_v17 = vpop.xlane.xlu2 %906  ;;  %v1355_v11 = vsel %vm1331_vm12, 1, %v3233_v44  ;;  %v1099_v12 = vsel %vm1075_vm13, 1, %v3233_v44 }
 0x324   : > { %v908_v14 = vcvt.f32.s32 %v907_v17  ;;  %1370 = vperm.xlu0 %3130, %v1355_v11   ;;  %1114 = vperm.xlu1 %3131, %v1099_v12  }
 0x326   : > { %v911_v15 = vadd.s32 %v910_v13, %v908_v14 }
 0x328   : > { %v3570_v23 = vmul.u32 %v3495_v26, %v911_v15 }
 0x32a   : > { %vm1076_vm14 = vcmp.eq.s32.totalorder %v3570_v23, 2  ;;  %vm1332_vm15 = vcmp.lt.s32.totalorder %v3570_v23, 2 }
 0x32b   : > { %v922_v19 = vpop.xlane.xlu0 %921  ;;  %v1100_v24 = vsel %vm1076_vm14, 1, %v3233_v44  ;;  %v1356_v25 = vsel %vm1332_vm15, 1, %v3233_v44 }
 0x32c   : > { %v923_v29 = vcvt.f32.s32 %v922_v19  ;;  %1117 = vperm.xlu2 %3129, %v1100_v24   ;;  %1373 = vperm.xlu1 %3131, %v1356_v25  }
 0x32e   : > { %v926_v31 = vadd.s32 %v925_v28, %v923_v29 }
 0x330   : > { %v3578_v27 = vmul.u32 %v3499_v34, %v926_v31 }
 0x332   : > { %vm1333_vm3 = vcmp.lt.s32.totalorder %v3578_v27, 2  ;;  %vm1077_vm4 = vcmp.eq.s32.totalorder %v3578_v27, 2 }
 0x333   : > { %v937_v26 = vpop.xlane.xlu1 %936  ;;  %v1357_v33 = vsel %vm1333_vm3, 1, %v3233_v44  ;;  %v1101_v35 = vsel %vm1077_vm4, 1, %v3233_v44 }
 0x334   : > { %v938_v39 = vcvt.f32.s32 %v937_v26  ;;  %1376 = vperm.xlu2 %3129, %v1357_v33   ;;  %1120 = vperm.xlu0 %3130, %v1101_v35  }
 0x336   : > { %v941_v40 = vadd.s32 %v940_v38, %v938_v39 }
 0x338   : > { %v3586_v37 = vmul.u32 %v3491_v21, %v941_v40 }
 0x33a   : > { %vm1078_vm5 = vcmp.eq.s32.totalorder %v3586_v37, 2  ;;  %vm1334_vm6 = vcmp.lt.s32.totalorder %v3586_v37, 2 }
 0x33b   : > { %v952_v34 = vpop.xlane.xlu1 %951  ;;  %v1102_v43 = vsel %vm1078_vm5, 1, %v3233_v44  ;;  %v1358_v45 = vsel %vm1334_vm6, 1, %v3233_v44 }
 0x33c   : > { %v953_v47 = vcvt.f32.s32 %v952_v34  ;;  %1123 = vperm.xlu1 %3131, %v1102_v43   ;;  %1379 = vperm.xlu0 %3130, %v1358_v45  }
 0x33e   : > { %v956_v48 = vadd.s32 %v955_v46, %v953_v47 }
 0x340   : > { %v3593_v49 = vmul.u32 %v3526_v36, %v956_v48 }
 0x342   : > { %vm1335_vm7 = vcmp.lt.s32.totalorder %v3593_v49, 2  ;;  %vm1079_vm8 = vcmp.eq.s32.totalorder %v3593_v49, 2 }
 0x343   : > { %v1359_v21 = vsel %vm1335_vm7, 1, %v3233_v44  ;;  %v1103_v41 = vsel %vm1079_vm8, 1, %v3233_v44 }
 0x344   : > { %1382 = vperm.xlu1 %3131, %v1359_v21   ;;  %1126 = vperm.xlu2 %3129, %v1103_v41  }
 0x34c   : > { %3132 = vset.pattern.permute.xlu1 %v3426_v30 }
 0x366   : > { %v1106_v50 = vpop.permute.xlu2 %1105 }
 0x367   : > { %v1128_v36 = vperm.slane %v1106_v50, %v3489_v20 }
 0x369   : > { %vm1184_vm10 = vcmp.ne.s32.totalorder %v1128_v36, 0 }
 0x36a   : > { %vm1192_vm11 = vmand %vm3602_vm9, %vm1184_vm10 }
 0x36b   : > { %v1200_v53 = vsel %vm1192_vm11, %v3489_v20, 4294967295 }
 0x36c   : > { %v3611_v54 = vsel %vm4325_vm0, %v1200_v53, 2147483648 }
 0x36d   : > { %v1210_v55 = vshra.s32 %v3611_v54, 16 }
 0x36e   : > { %v1365_v56 = vpop.permute.xlu2 %1364 }
 0x36f   : > { %v1385_v57 = vperm.slane %v1365_v56, %v3489_v20  ;;  %v3615_v58 = vcvt.s32.f32 %v1210_v55 }
 0x371   : > { %vm1441_vm12 = vcmp.ne.s32.totalorder %v1385_v57, 0  ;;  %1213 = vmax.xlane.f32.xlu0 %v3615_v58 }
 0x372   : > { %vm1449_vm13 = vmand %vm3602_vm9, %vm1441_vm12 }
 0x373   : > { %v1457_v16 = vsel %vm1449_vm13, %v3489_v20, 4294967295 }
 0x374   : > { %v3622_v60 = vsel %vm4325_vm0, %v1457_v16, 2147483648 }
 0x375   : > { %v1481_v61 = vshra.s32 %v3622_v60, 16 }
 0x376   : > { %v1368_v62 = vpop.permute.xlu2 %1367 }
 0x377   : > { %v3625_v63 = vcvt.s32.f32 %v1481_v61  ;;  %v1386_v0 = vperm.slane %v1368_v62, %v3489_v20 }
 0x379   : > { %1484 = vmax.xlane.f32.xlu0 %v3625_v63  ;;  %vm1442_vm14 = vcmp.ne.s32.totalorder %v1386_v0, 0 }
 0x37a   : > { %vm1450_vm15 = vmand %vm3602_vm9, %vm1442_vm14 }
 0x37b   : > { %v1458_v5 = vsel %vm1450_vm15, %v3489_v20, 4294967295 }
 0x37c   : > { %v3645_v13 = vsel %vm4325_vm0, %v1458_v5, 2147483648 }
 0x37d   : > { %v1496_v15 = vshra.s32 %v3645_v13, 16 }
 0x37e   : > { %v1362_v1 = vpop.permute.xlu0 %1361 }
 0x37f   : > { %v1384_v18 = vperm.slane %v1362_v1, %v3489_v20  ;;  %v3663_v26 = vcvt.s32.f32 %v1496_v15 }
 0x381   : > { %vm1440_vm3 = vcmp.ne.s32.totalorder %v1384_v18, 0 }
 0x382   : > { %vm1448_vm4 = vmand %vm3602_vm9, %vm1440_vm3 }
 0x383   : > { %v1456_v3 = vsel %vm1448_vm4, %v3489_v20, 4294967295 }
 0x384   : > { %v3636_v4 = vsel %vm4325_vm0, %v1456_v3, 2147483648 }
 0x385   : > { %v1466_v6 = vshra.s32 %v3636_v4, 16 }
 0x386   : > { %v1109_v8 = vpop.permute.xlu1 %1108  ;;  %v1118_v9 = vpop.permute.xlu2 %1117 }
 0x387   : > { %v1129_v17 = vperm.slane %v1109_v8, %v3489_v20  ;;  %v1132_v11 = vperm.slane %v1118_v9, %v3489_v20  ;;  %v3642_v12 = vcvt.s32.f32 %v1466_v6 }
 0x389   : > { %vm1185_vm5 = vcmp.ne.s32.totalorder %v1129_v17, 0  ;;  %vm1188_vm6 = vcmp.ne.s32.totalorder %v1132_v11, 0  ;;  %1469 = vmax.xlane.f32.xlu1 %v3642_v12 }
 0x38a   : > { %vm1193_vm7 = vmand %vm3602_vm9, %vm1185_vm5 }
 0x38b   : > { %v1201_v14 = vsel %vm1193_vm7, %v3489_v20, 4294967295  ;;  %vm1196_vm8 = vmand %vm3602_vm9, %vm1188_vm6 }
 0x38c   : > { %v3655_v22 = vsel %vm4325_vm0, %v1201_v14, 2147483648  ;;  %v1204_v19 = vsel %vm1196_vm8, %v3489_v20, 4294967295 }
 0x38d   : > { %v1225_v24 = vshra.s32 %v3655_v22, 16  ;;  %v3666_v33 = vsel %vm4325_vm0, %v1204_v19, 2147483648 }
 0x38e   : > { %v1112_v25 = vpop.permute.xlu1 %1111  ;;  %v1377_v28 = vpop.permute.xlu2 %1376  ;;  %v1270_v38 = vshra.s32 %v3666_v33, 16 }
 0x38f   : > { %v1130_v29 = vperm.slane %v1112_v25, %v3489_v20  ;;  %v1389_v31 = vperm.slane %v1377_v28, %v3489_v20  ;;  %v3661_v32 = vcvt.s32.f32 %v1225_v24 }
 0x390   : > { %v3685_v48 = vcvt.s32.f32 %v1270_v38 }
 0x391   : > { %vm1186_vm10 = vcmp.ne.s32.totalorder %v1130_v29, 0  ;;  %vm1445_vm11 = vcmp.ne.s32.totalorder %v1389_v31, 0  ;;  %1228 = vmax.xlane.f32.xlu2 %v3661_v32  ;;  %1499 = vmax.xlane.f32.xlu1 %v3663_v26 }
 0x392   : > { %vm1194_vm12 = vmand %vm3602_vm9, %vm1186_vm10 }
 0x393   : > { %v1202_v35 = vsel %vm1194_vm12, %v3489_v20, 4294967295  ;;  %vm1453_vm13 = vmand %vm3602_vm9, %vm1445_vm11 }
 0x394   : > { %v3677_v39 = vsel %vm4325_vm0, %v1202_v35, 2147483648  ;;  %v1461_v40 = vsel %vm1453_vm13, %v3489_v20, 4294967295 }
 0x395   : > { %v1240_v42 = vshra.s32 %v3677_v39, 16  ;;  %v3688_v21 = vsel %vm4325_vm0, %v1461_v40, 2147483648 }
 0x396   : > { %v1115_v34 = vpop.permute.xlu1 %1114  ;;  %v1371_v43 = vpop.permute.xlu0 %1370  ;;  %v1541_v50 = vshra.s32 %v3688_v21, 16 }
 0x397   : > { %v1131_v45 = vperm.slane %v1115_v34, %v3489_v20  ;;  %v1387_v46 = vperm.slane %v1371_v43, %v3489_v20  ;;  %v3683_v47 = vcvt.s32.f32 %v1240_v42 }
 0x398   : > { %v3711_v18 = vcvt.s32.f32 %v1541_v50 }
 0x399   : > { %vm1187_vm14 = vcmp.ne.s32.totalorder %v1131_v45, 0  ;;  %vm1443_vm15 = vcmp.ne.s32.totalorder %v1387_v46, 0  ;;  %1243 = vmax.xlane.f32.xlu2 %v3683_v47  ;;  %1273 = vmax.xlane.f32.xlu1 %v3685_v48 }
 0x39a   : > { %vm1195_vm3 = vmand %vm3602_vm9, %vm1187_vm14 }
 0x39b   : > { %v1203_v41 = vsel %vm1195_vm3, %v3489_v20, 4294967295  ;;  %vm1451_vm4 = vmand %vm3602_vm9, %vm1443_vm15 }
 0x39c   : > { %v1459_v36 = vsel %vm1451_vm4, %v3489_v20, 4294967295  ;;  %v3700_v53 = vsel %vm4325_vm0, %v1203_v41, 2147483648 }
 0x39d   : > { %v1255_v55 = vshra.s32 %v3700_v53, 16  ;;  %v3704_v56 = vsel %vm4325_vm0, %v1459_v36, 2147483648 }
 0x39e   : > { %v1374_v57 = vpop.permute.xlu1 %1373  ;;  %v1127_v16 = vpop.permute.xlu2 %1126  ;;  %v1511_v61 = vshra.s32 %v3704_v56, 16 }
 0x39f   : > { %v1388_v62 = vperm.slane %v1374_v57, %v3489_v20  ;;  %v1135_v0 = vperm.slane %v1127_v16, %v3489_v20  ;;  %v3709_v1 = vcvt.s32.f32 %v1255_v55 }
 0x3a0   : > { %v3713_v3 = vcvt.s32.f32 %v1511_v61 }
 0x3a1   : > { %vm1444_vm5 = vcmp.ne.s32.totalorder %v1388_v62, 0  ;;  %vm1191_vm6 = vcmp.ne.s32.totalorder %v1135_v0, 0  ;;  %1258 = vmax.xlane.f32.xlu0 %v3709_v1  ;;  %1544 = vmax.xlane.f32.xlu1 %v3711_v18 }
 0x3a2   : > { %vm1452_vm7 = vmand %vm3602_vm9, %vm1444_vm5  ;;  %1514 = vmax.xlane.f32.xlu2 %v3713_v3 }
 0x3a3   : > { %v1460_v5 = vsel %vm1452_vm7, %v3489_v20, 4294967295  ;;  %vm1199_vm8 = vmand %vm3602_vm9, %vm1191_vm6 }
 0x3a4   : > { %v1207_v6 = vsel %vm1199_vm8, %v3489_v20, 4294967295  ;;  %v3725_v8 = vsel %vm4325_vm0, %v1460_v5, 2147483648 }
 0x3a5   : > { %v1526_v9 = vshra.s32 %v3725_v8, 16  ;;  %v3729_v17 = vsel %vm4325_vm0, %v1207_v6, 2147483648  ;;  %v1209_v6 = vand.u32 65535, %v3611_v54  ;;  %v1465_v54 = vand.u32 65535, %v3636_v4 }
 0x3a6   : > { %v1121_v11 = vpop.permute.xlu0 %1120  ;;  %v1315_v14 = vshra.s32 %v3729_v17, 16 }
 0x3a7   : > { %v1133_v15 = vperm.slane %v1121_v11, %v3489_v20  ;;  %v3733_v19 = vcvt.s32.f32 %v1526_v9  ;;  %v1211_v11 = vcvt.s32.f32 %v1209_v6 }
 0x3a8   : > { %v3735_v24 = vcvt.s32.f32 %v1315_v14  ;;  %v1480_v14 = vand.u32 65535, %v3622_v60  ;;  %v1224_v60 = vand.u32 65535, %v3655_v22  ;;  %v1239_v22 = vand.u32 65535, %v3677_v39 }
 0x3a9   : > { %vm1189_vm10 = vcmp.ne.s32.totalorder %v1133_v15, 0  ;;  %1529 = vmax.xlane.f32.xlu0 %v3733_v19  ;;  %v1540_v39 = vand.u32 65535, %v3688_v21 }
 0x3aa   : > { %vm1197_vm11 = vmand %vm3602_vm9, %vm1189_vm10  ;;  %1318 = vmax.xlane.f32.xlu1 %v3735_v24 }
 0x3ab   : > { %v1205_v25 = vsel %vm1197_vm11, %v3489_v20, 4294967295 }
 0x3ac   : > { %v3743_v28 = vsel %vm4325_vm0, %v1205_v25, 2147483648  ;;  %v1482_v25 = vcvt.s32.f32 %v1480_v14  ;;  %v1525_v14 = vand.u32 65535, %v3725_v8 }
 0x3ad   : > { %v1285_v29 = vshra.s32 %v3743_v28, 16  ;;  %v1284_v8 = vand.u32 65535, %v3743_v28 }
 0x3ae   : > { %v1124_v31 = vpop.permute.xlu1 %1123  ;;  %v1380_v35 = vpop.permute.xlu0 %1379 }
 0x3af   : > { %v1134_v38 = vperm.slane %v1124_v31, %v3489_v20  ;;  %v1390_v40 = vperm.slane %v1380_v35, %v3489_v20  ;;  %v3748_v42 = vcvt.s32.f32 %v1285_v29  ;;  %v1467_v35 = vcvt.s32.f32 %v1465_v54 }
 0x3b1   : > { %vm1190_vm12 = vcmp.ne.s32.totalorder %v1134_v38, 0  ;;  %vm1446_vm13 = vcmp.ne.s32.totalorder %v1390_v40, 0  ;;  %1288 = vmax.xlane.f32.xlu2 %v3748_v42  ;;  %v1495_v38 = vand.u32 65535, %v3645_v13  ;;  %v1269_v13 = vand.u32 65535, %v3666_v33 }
 0x3b2   : > { %vm1198_vm14 = vmand %vm3602_vm9, %vm1190_vm12  ;;  %v1254_v33 = vand.u32 65535, %v3700_v53 }
 0x3b3   : > { %v1206_v34 = vsel %vm1198_vm14, %v3489_v20, 4294967295  ;;  %vm1454_vm15 = vmand %vm3602_vm9, %vm1446_vm13 }
 0x3b4   : > { %v1462_v43 = vsel %vm1454_vm15, %v3489_v20, 4294967295  ;;  %v3758_v45 = vsel %vm4325_vm0, %v1206_v34, 2147483648 }
 0x3b5   : > { %v1300_v46 = vshra.s32 %v3758_v45, 16  ;;  %v3762_v41 = vsel %vm4325_vm0, %v1462_v43, 2147483648  ;;  %v1497_v43 = vcvt.s32.f32 %v1495_v38  ;;  %v1299_v38 = vand.u32 65535, %v3758_v45 }
 0x3b6   : > { %v1383_v50 = vpop.permute.xlu1 %1382  ;;  %v1556_v36 = vshra.s32 %v3762_v41, 16 }
 0x3b7   : > { %v1391_v55 = vperm.slane %v1383_v50, %v3489_v20  ;;  %v3766_v57 = vcvt.s32.f32 %v1300_v46 }
 0x3b8   : > { %v3768_v16 = vcvt.s32.f32 %v1556_v36  ;;  %v1241_v36 = vcvt.s32.f32 %v1239_v22 }
 0x3b9   : > { %vm1447_vm3 = vcmp.ne.s32.totalorder %v1391_v55, 0  ;;  %1303 = vmax.xlane.f32.xlu0 %v3766_v57  ;;  %v1271_v55 = vcvt.s32.f32 %v1269_v13 }
 0x3ba   : > { %vm1455_vm4 = vmand %vm3602_vm9, %vm1447_vm3  ;;  %1559 = vmax.xlane.f32.xlu2 %v3768_v16 }
 0x3bb   : > { %v1463_v61 = vsel %vm1455_vm4, %v3489_v20, 4294967295 }
 0x3bc   : > { %v3776_v62 = vsel %vm4325_vm0, %v1463_v61, 2147483648  ;;  %v1510_v61 = vand.u32 65535, %v3704_v56  ;;  %vm4326_vm0 = vcmask 1044484  }
 0x3bd   : > { %v1571_v0 = vshra.s32 %v3776_v62, 16  ;;  %v1570_v45 = vand.u32 65535, %v3776_v62 }
 0x3bf   : > { %v3779_v5 = vcvt.s32.f32 %v1571_v0 }
 0x3c1   : > { %1574 = vmax.xlane.f32.xlu0 %v3779_v5 }
 0x3e4   : > { %v3783_v9 = vpop.xlane.xlu0 %1213 }
 0x3e5   : > { %vm1215_vm9 = vcmp.eq.f32.partialorder %v3615_v58, %v3783_v9  ;;  %v1220_v13 = vcvt.f32.s32 %v3783_v9 }
 0x3e6   : > { %v1216_v52 = vsel %vm1215_vm9, %v1211_v11, -inf  ;;  %v1542_v11 = vcvt.s32.f32 %v1540_v39 }
 0x3e7   : > { %1217 = vmax.xlane.f32.xlu2 %v1216_v52  ;;  %v1256_v52 = vcvt.s32.f32 %v1254_v33 }
 0x3ec   : > { %v3788_v15 = vpop.xlane.xlu0 %1484 }
 0x3ed   : > { %vm1486_vm5 = vcmp.eq.f32.partialorder %v3625_v63, %v3788_v15  ;;  %v1226_v63 = vcvt.s32.f32 %v1224_v60 }
 0x3ee   : > { %v1487_v29 = vsel %vm1486_vm5, %v1482_v25, -inf  ;;  %v1314_v25 = vand.u32 65535, %v3729_v17  ;;  %v1286_v17 = vcvt.s32.f32 %v1284_v8 }
 0x3ef   : > { %1488 = vmax.xlane.f32.xlu2 %v1487_v29 }
 0x3fc   : > { %v3793_v31 = vpop.xlane.xlu1 %1469 }
 0x3fd   : > { %vm1471_vm6 = vcmp.eq.f32.partialorder %v3642_v12, %v3793_v31  ;;  %v1476_v62 = vcvt.f32.s32 %v3793_v31 }
 0x3fe   : > { %v1472_v58 = vsel %vm1471_vm6, %v1467_v35, -inf  ;;  %v1316_v35 = vcvt.s32.f32 %v1314_v25 }
 0x3ff   : > { %1473 = vmax.xlane.f32.xlu0 %v1472_v58 }
 0x404   : > { %v3799_v40 = vpop.xlane.xlu2 %1228  ;;  %v3801_v34 = vpop.xlane.xlu1 %1499 }
 0x405   : > { %vm1230_vm7 = vcmp.eq.f32.partialorder %v3661_v32, %v3799_v40  ;;  %vm1501_vm8 = vcmp.eq.f32.partialorder %v3663_v26, %v3801_v34 }
 0x406   : > { %v1231_v4 = vsel %vm1230_vm7, %v1226_v63, -inf  ;;  %v1502_v12 = vsel %vm1501_vm8, %v1497_v43, -inf  ;;  %vm1708_vm7 = vcmp.eq.s32.totalorder %v3489_v20, 7 }
 0x407   : > { %1232 = vmax.xlane.f32.xlu1 %v1231_v4  ;;  %1503 = vmax.xlane.f32.xlu0 %v1502_v12 }
 0x40c   : > { %v3809_v46 = vpop.xlane.xlu2 %1243  ;;  %v3811_v50 = vpop.xlane.xlu1 %1273 }
 0x40d   : > { %vm1245_vm10 = vcmp.eq.f32.partialorder %v3683_v47, %v3809_v46  ;;  %vm1275_vm11 = vcmp.eq.f32.partialorder %v3685_v48, %v3811_v50  ;;  %v1512_v48 = vcvt.s32.f32 %v1510_v61  ;;  %v1491_v61 = vcvt.f32.s32 %v3788_v15 }
 0x40e   : > { %v1246_v32 = vsel %vm1245_vm10, %v1241_v36, -inf  ;;  %v1276_v26 = vsel %vm1275_vm11, %v1271_v55, -inf }
 0x40f   : > { %1247 = vmax.xlane.f32.xlu1 %v1246_v32  ;;  %1277 = vmax.xlane.f32.xlu0 %v1276_v26  ;;  %v1221_v32 = vshll.u32 %v1220_v13, 16  ;;  %v1477_v26 = vshll.u32 %v1476_v62, 16 }
 0x414   : > { %v3820_v0 = vpop.xlane.xlu1 %1544  ;;  %v3822_v6 = vpop.xlane.xlu0 %1258 }
 0x415   : > { %v3824_v47 = vpop.xlane.xlu2 %1514  ;;  %vm1546_vm12 = vcmp.eq.f32.partialorder %v3711_v18, %v3820_v0  ;;  %vm1260_vm13 = vcmp.eq.f32.partialorder %v3709_v1, %v3822_v6  ;;  %v1527_v18 = vcvt.s32.f32 %v1525_v14  ;;  %v1265_v13 = vcvt.f32.s32 %v3822_v6 }
 0x416   : > { %v1547_v21 = vsel %vm1546_vm12, %v1542_v11, -inf  ;;  %vm1516_vm14 = vcmp.eq.f32.partialorder %v3713_v3, %v3824_v47  ;;  %v1261_v53 = vsel %vm1260_vm13, %v1256_v52, -inf  ;;  %v1235_v52 = vcvt.f32.s32 %v3799_v40 }
 0x417   : > { %1548 = vmax.xlane.f32.xlu0 %v1547_v21  ;;  %v1517_v56 = vsel %vm1516_vm14, %v1512_v48, -inf  ;;  %1262 = vmax.xlane.f32.xlu2 %v1261_v53  ;;  %vm3234_vm13 = vmmov 1   ;;  %v1521_v62 = vcvt.f32.s32 %v3824_v47 }
 0x418   : > { %1518 = vmax.xlane.f32.xlu1 %v1517_v56  ;;  %v1492_v56 = vshll.u32 %v1491_v61, 16  ;;  %v1236_v25 = vshll.u32 %v1235_v52, 16 }
 0x41c   : > { %v3834_v29 = vpop.xlane.xlu0 %1529 }
 0x41d   : > { %v3836_v54 = vpop.xlane.xlu1 %1318  ;;  %vm1531_vm15 = vcmp.eq.f32.partialorder %v3733_v19, %v3834_v29  ;;  %v1555_v19 = vand.u32 65535, %v3762_v41  ;;  %v1572_v41 = vcvt.s32.f32 %v1570_v45 }
 0x41e   : > { %vm1320_vm3 = vcmp.eq.f32.partialorder %v3735_v24, %v3836_v54  ;;  %v1532_v1 = vsel %vm1531_vm15, %v1527_v18, -inf  ;;  %v1301_v24 = vcvt.s32.f32 %v1299_v38 }
 0x41f   : > { %v1321_v3 = vsel %vm1320_vm3, %v1316_v35, -inf  ;;  %1533 = vmax.xlane.f32.xlu2 %v1532_v1  ;;  %v1557_v4 = vcvt.s32.f32 %v1555_v19  ;;  %v1506_v1 = vcvt.f32.s32 %v3801_v34 }
 0x420   : > { %1322 = vmax.xlane.f32.xlu0 %v1321_v3 }
 0x424   : > { %v3843_v58 = vpop.xlane.xlu2 %1288 }
 0x425   : > { %vm1290_vm4 = vcmp.eq.f32.partialorder %v3748_v42, %v3843_v58 }
 0x426   : > { %v1291_v60 = vsel %vm1290_vm4, %v1286_v17, -inf  ;;  %v1250_v17 = vcvt.f32.s32 %v3809_v46  ;;  %v3235_v46 = vmov 0.0  }
 0x427   : > { %1292 = vmax.xlane.f32.xlu1 %v1291_v60 }
 0x428   : > { %v1251_v34 = vshll.u32 %v1250_v17, 16 }
 0x42c   : > { %v3849_v63 = vpop.xlane.xlu0 %1303 }
 0x42d   : > { %v3851_v43 = vpop.xlane.xlu2 %1559  ;;  %vm1305_vm9 = vcmp.eq.f32.partialorder %v3766_v57, %v3849_v63  ;;  %v1709_v57 = vsel %vm1708_vm7, 1, %v3233_v44 }
 0x42e   : > { %vm1561_vm5 = vcmp.eq.f32.partialorder %v3768_v16, %v3851_v43  ;;  %v1306_v28 = vsel %vm1305_vm9, %v1301_v24, -inf }
 0x42f   : > { %v1562_v42 = vsel %vm1561_vm5, %v1557_v4, -inf  ;;  %1307 = vmax.xlane.f32.xlu2 %v1306_v28  ;;  %v1507_v28 = vshll.u32 %v1506_v1, 16 }
 0x430   : > { %1563 = vmax.xlane.f32.xlu1 %v1562_v42 }
 0x434   : > { %v3858_v12 = vpop.xlane.xlu0 %1574 }
 0x435   : > { %vm1576_vm6 = vcmp.eq.f32.partialorder %v3779_v5, %v3858_v12 }
 0x436   : > { %v1577_v22 = vsel %vm1576_vm6, %v1572_v41, -inf }
 0x437   : > { %1578 = vmax.xlane.f32.xlu2 %v1577_v22 }
 0x449   : > { %1714 = vperm.xlu1 %3132, %v1709_v57  }
 0x451   : > { %3148 = vset.pattern.permute.xlu1 %v3233_v44 }
 0x45a   : > { %v1218_v16 = vpop.xlane.xlu2 %1217 }
 0x45b   : > { %v1219_v36 = vcvt.f32.s32 %v1218_v16 }
 0x45d   : > { %v1222_v5 = vadd.s32 %v1221_v32, %v1219_v36 }
 0x462   : > { %v1489_v11 = vpop.xlane.xlu2 %1488 }
 0x463   : > { %v1490_v21 = vcvt.f32.s32 %v1489_v11  ;;  %v1266_v11 = vshll.u32 %v1265_v13, 16 }
 0x465   : > { %v1493_v40 = vadd.s32 %v1492_v56, %v1490_v21 }
 0x472   : > { %v1474_v55 = vpop.xlane.xlu0 %1473 }
 0x473   : > { %v1475_v39 = vcvt.f32.s32 %v1474_v55 }
 0x475   : > { %v1478_v33 = vadd.s32 %v1477_v26, %v1475_v39 }
 0x477   : > { %vm1584_vm8 = vcmp.gt.s32.totalorder %v1222_v5, %v1478_v33 }
 0x478   : > { %v1592_v48 = vsel %vm1584_vm8, %v1222_v5, 4294967294  ;;  %v1616_v9 = vsel %vm1584_vm8, 1, %v3233_v44 }
 0x479   : > { %v1600_v31 = vperm.slane %v1592_v48, 7  ;;  %v1624_v53 = vperm.slane %v1616_v9, 7  ;;  %v1522_v9 = vshll.u32 %v1521_v62, 16 }
 0x47a   : > { %v1233_v14 = vpop.xlane.xlu1 %1232  ;;  %v1504_v8 = vpop.xlane.xlu0 %1503 }
 0x47b   : > { %vm1608_vm10 = vcmp.eq.s32.totalorder %v1592_v48, %v1600_v31  ;;  %vm3872_vm11 = vcmp.eq.s32.totalorder %v1624_v53, 1  ;;  %v1234_v15 = vcvt.f32.s32 %v1233_v14  ;;  %v1505_v4 = vcvt.f32.s32 %v1504_v8 }
 0x47c   : > { %vm1640_vm12 = vmand %vm3872_vm11, %vm1608_vm10  ;;  %vm4330_vm10 = vcmask 1041409   ;;  %v1280_v14 = vcvt.f32.s32 %v3811_v50 }
 0x47d   : > { %vm1648_vm14 = vmxor %vm1640_vm12, %vm3234_vm13  ;;  %v1237_v35 = vadd.s32 %v1236_v25, %v1234_v15  ;;  %v1508_v57 = vadd.s32 %v1507_v28, %v1505_v4  ;;  %v1536_v25 = vcvt.f32.s32 %v3834_v29 }
 0x47e   : > { %vm3881_vm15 = vmand %vm1584_vm8, %vm1648_vm14  ;;  %v1281_v50 = vshll.u32 %v1280_v14, 16 }
 0x47f   : > { %vm1585_vm3 = vcmp.gt.s32.totalorder %v1237_v35, %v1493_v40  ;;  %v2819_v22 = vsel %vm3881_vm15, 1.0, %v3235_v46 }
 0x480   : > { %v1593_v60 = vsel %vm1585_vm3, %v1237_v35, 4294967294  ;;  %v1617_v38 = vsel %vm1585_vm3, 1, %v3233_v44  ;;  %v1691_v55 = vperm.slane %v2819_v22, %v3489_v20 }
 0x481   : > { %v1601_v19 = vperm.slane %v1593_v60, 7  ;;  %v1625_v24 = vperm.slane %v1617_v38, 7 }
 0x482   : > { %v1248_v42 = vpop.xlane.xlu1 %1247  ;;  %v1278_v21 = vpop.xlane.xlu0 %1277 }
 0x483   : > { %vm1609_vm4 = vcmp.eq.s32.totalorder %v1593_v60, %v1601_v19  ;;  %vm3889_vm9 = vcmp.eq.s32.totalorder %v1625_v24, 1  ;;  %v1249_v41 = vcvt.f32.s32 %v1248_v42  ;;  %v1279_v35 = vcvt.f32.s32 %v1278_v21 }
 0x484   : > { %vm1641_vm5 = vmand %vm3889_vm9, %vm1609_vm4  ;;  %v1537_v19 = vshll.u32 %v1536_v25, 16  ;;  %v1551_v42 = vcvt.f32.s32 %v3820_v0 }
 0x485   : > { %vm1649_vm6 = vmxor %vm1641_vm5, %vm3234_vm13  ;;  %v1252_v16 = vadd.s32 %v1251_v34, %v1249_v41  ;;  %vm4328_vm5 = vcmask 1042434   ;;  %v1282_v4 = vadd.s32 %v1281_v50, %v1279_v35  ;;  %v1295_v34 = vcvt.f32.s32 %v3843_v58 }
 0x486   : > { %vm1657_vm7 = vmand %vm1585_vm3, %vm1649_vm6  ;;  %v1552_v58 = vshll.u32 %v1551_v42, 16 }
 0x487   : > { %v2820_v36 = vsel %vm1657_vm7, 1.0, %v3235_v46  ;;  %vm1586_vm8 = vcmp.gt.s32.totalorder %v1252_v16, %v1508_v57 }
 0x488   : > { %v1692_v32 = vperm.slane %v2820_v36, %v3489_v20  ;;  %v1594_v26 = vsel %vm1586_vm8, %v1252_v16, 4294967294  ;;  %v1618_v39 = vsel %vm1586_vm8, 1, %v3233_v44 }
 0x489   : > { %v1602_v5 = vperm.slane %v1594_v26, 7  ;;  %v1626_v33 = vperm.slane %v1618_v39, 7 }
 0x48a   : > { %v1263_v6 = vpop.xlane.xlu2 %1262  ;;  %v1699_v61 = vsel %vm4330_vm10, %v1692_v32, %v1691_v55  ;;  %v1549_v41 = vpop.xlane.xlu0 %1548  ;;  %v1296_v55 = vshll.u32 %v1295_v34, 16 }
 0x48b   : > { %vm1610_vm12 = vcmp.eq.s32.totalorder %v1594_v26, %v1602_v5  ;;  %vm3909_vm14 = vcmp.eq.s32.totalorder %v1626_v33, 1  ;;  %v1519_v52 = vpop.xlane.xlu1 %1518  ;;  %v1264_v48 = vcvt.f32.s32 %v1263_v6  ;;  %v1550_v62 = vcvt.f32.s32 %v1549_v41 }
 0x48c   : > { %vm1642_vm15 = vmand %vm3909_vm14, %vm1610_vm12  ;;  %v1520_v31 = vcvt.f32.s32 %v1519_v52  ;;  %v4359_v26 = vmov 0  ;;  %v1566_v52 = vcvt.f32.s32 %v3851_v43 }
 0x48d   : > { %vm1650_vm3 = vmxor %vm1642_vm15, %vm3234_vm13  ;;  %v1267_v53 = vadd.s32 %v1266_v11, %v1264_v48  ;;  %v1553_v33 = vadd.s32 %v1552_v58, %v1550_v62 }
 0x48e   : > { %vm1658_vm4 = vmand %vm1586_vm8, %vm1650_vm3  ;;  %v1523_v56 = vadd.s32 %v1522_v9, %v1520_v31 }
 0x48f   : > { %v2821_v15 = vsel %vm1658_vm4, 1.0, %v3235_v46 }
 0x490   : > { %v1693_v40 = vperm.slane %v2821_v15, %v3489_v20  ;;  %vm1587_vm6 = vcmp.gt.s32.totalorder %v1267_v53, %v1523_v56 }
 0x491   : > { %v1595_v1 = vsel %vm1587_vm6, %v1267_v53, 4294967294  ;;  %v1619_v3 = vsel %vm1587_vm6, 1, %v3233_v44 }
 0x492   : > { %v1603_v8 = vperm.slane %v1595_v1, 7  ;;  %v1627_v17 = vperm.slane %v1619_v3, 7  ;;  %v1534_v60 = vpop.xlane.xlu2 %1533  ;;  %v1700_v38 = vsel %vm4328_vm5, %v1693_v40, %v1699_v61  ;;  %v1310_v61 = vcvt.f32.s32 %v3849_v63 }
 0x493   : > { %v1535_v29 = vcvt.f32.s32 %v1534_v60  ;;  %v4361_v63 = vmov 0  ;;  %v1567_v40 = vshll.u32 %v1566_v52, 16  ;;  %v1323_v3 = vpop.xlane.xlu0 %1322  ;;  %v1581_v60 = vcvt.f32.s32 %v3858_v12 }
 0x494   : > { %vm1611_vm7 = vcmp.eq.s32.totalorder %v1595_v1, %v1603_v8  ;;  %vm3925_vm8 = vcmp.eq.s32.totalorder %v1627_v17, 1  ;;  %v1311_v25 = vshll.u32 %v1310_v61, 16  ;;  %v1325_v17 = vcvt.f32.s32 %v3836_v54 }
 0x495   : > { %vm1643_vm12 = vmand %vm3925_vm8, %vm1611_vm7  ;;  %v1538_v28 = vadd.s32 %v1537_v19, %v1535_v29  ;;  %v1324_v19 = vcvt.f32.s32 %v1323_v3 }
 0x496   : > { %vm1651_vm15 = vmxor %vm1643_vm12, %vm3234_vm13  ;;  %v1326_v54 = vshll.u32 %v1325_v17, 16 }
 0x497   : > { %vm1659_vm3 = vmand %vm1587_vm6, %vm1651_vm15  ;;  %vm1588_vm4 = vcmp.gt.s32.totalorder %v1282_v4, %v1538_v28 }
 0x498   : > { %v2822_v22 = vsel %vm1659_vm3, 1.0, %v3235_v46  ;;  %v1596_v57 = vsel %vm1588_vm4, %v1282_v4, 4294967294  ;;  %v1620_v16 = vsel %vm1588_vm4, 1, %v3233_v44 }
 0x499   : > { %v1694_v13 = vperm.slane %v2822_v22, %v3489_v20  ;;  %v1604_v0 = vperm.slane %v1596_v57, 7  ;;  %v1628_v36 = vperm.slane %v1620_v16, 7  ;;  %v1582_v22 = vshll.u32 %v1581_v60, 16 }
 0x49a   : > { %v1293_v32 = vpop.xlane.xlu1 %1292  ;;  %v1327_v16 = vadd.s32 %v1326_v54, %v1324_v19 }
 0x49b   : > { %vm1612_vm7 = vcmp.eq.s32.totalorder %v1596_v57, %v1604_v0  ;;  %vm3940_vm12 = vcmp.eq.s32.totalorder %v1628_v36, 1  ;;  %v1294_v39 = vcvt.f32.s32 %v1293_v32  ;;  %v1701_v5 = vsel %vm4327_vm2, %v1694_v13, %v1700_v38 }
 0x49c   : > { %v4360_v26 = vsel %vm3940_vm12, 4294967295, %v4359_v26  ;;  %vm1644_vm6 = vmand %vm3940_vm12, %vm1612_vm7 }
 0x49d   : > { %vm1652_vm15 = vmxor %vm1644_vm6, %vm3234_vm13  ;;  %v1297_v6 = vadd.s32 %v1296_v55, %v1294_v39  ;;  %v3041_v39 = vld [vmem:[%s4307_s8 + $0x30] sm:$0xff] }
 0x49e   : > { %vm1660_vm3 = vmand %vm1588_vm4, %vm1652_vm15 }
 0x49f   : > { %v2823_v11 = vsel %vm1660_vm3, 1.0, %v3235_v46  ;;  %vm1589_vm1 = vcmp.gt.s32.totalorder %v1297_v6, %v1553_v33 }
 0x4a0   : > { %v1695_v48 = vperm.slane %v2823_v11, %v3489_v20  ;;  %v1597_v9 = vsel %vm1589_vm1, %v1297_v6, 4294967294  ;;  %v1621_v21 = vsel %vm1589_vm1, 1, %v3233_v44 }
 0x4a1   : > { %v1605_v31 = vperm.slane %v1597_v9, 7  ;;  %v1629_v53 = vperm.slane %v1621_v21, 7 }
 0x4a2   : > { %v1308_v56 = vpop.xlane.xlu2 %1307  ;;  %v1702_v14 = vsel %vm4326_vm0, %v1695_v48, %v1701_v5  ;;  %vm4329_vm0 = vcmask 1045509  }
 0x4a3   : > { %vm1613_vm4 = vcmp.eq.s32.totalorder %v1597_v9, %v1605_v31  ;;  %vm3957_vm7 = vcmp.eq.s32.totalorder %v1629_v53, 1  ;;  %v1564_v15 = vpop.xlane.xlu1 %1563  ;;  %v1309_v43 = vcvt.f32.s32 %v1308_v56 }
 0x4a4   : > { %v4362_v63 = vsel %vm3957_vm7, 4294967295, %v4361_v63  ;;  %vm1645_vm6 = vmand %vm3957_vm7, %vm1613_vm4  ;;  %v1565_v35 = vcvt.f32.s32 %v1564_v15 }
 0x4a5   : > { %vm1653_vm15 = vmxor %vm1645_vm6, %vm3234_vm13  ;;  %v1312_v1 = vadd.s32 %v1311_v25, %v1309_v43 }
 0x4a6   : > { %vm1661_vm3 = vmand %vm1589_vm1, %vm1653_vm15  ;;  %v1568_v8 = vadd.s32 %v1567_v40, %v1565_v35 }
 0x4a7   : > { %v2824_v38 = vsel %vm1661_vm3, 1.0, %v3235_v46 }
 0x4a8   : > { %v1696_v50 = vperm.slane %v2824_v38, %v3489_v20  ;;  %vm1590_vm2 = vcmp.gt.s32.totalorder %v1312_v1, %v1568_v8 }
 0x4a9   : > { %v1598_v29 = vsel %vm1590_vm2, %v1312_v1, 4294967294  ;;  %v1622_v4 = vsel %vm1590_vm2, 1, %v3233_v44 }
 0x4aa   : > { %v1606_v28 = vperm.slane %v1598_v29, 7  ;;  %v1630_v42 = vperm.slane %v1622_v4, 7  ;;  %v1579_v34 = vpop.xlane.xlu2 %1578  ;;  %v1703_v41 = vsel %vm4329_vm0, %v1696_v50, %v1702_v14  ;;  %vm1064_vm0 = vcmask 1046534  }
 0x4ab   : > { %v1580_v12 = vcvt.f32.s32 %v1579_v34 }
 0x4ac   : > { %vm1614_vm1 = vcmp.eq.s32.totalorder %v1598_v29, %v1606_v28  ;;  %vm3973_vm4 = vcmp.eq.s32.totalorder %v1630_v42, 1 }
 0x4ad   : > { %vm1646_vm6 = vmand %vm3973_vm4, %vm1614_vm1  ;;  %v1583_v13 = vadd.s32 %v1582_v22, %v1580_v12 }
 0x4ae   : > { %vm1654_vm15 = vmxor %vm1646_vm6, %vm3234_vm13 }
 0x4af   : > { %vm1662_vm3 = vmand %vm1590_vm2, %vm1654_vm15  ;;  %vm1591_vm5 = vcmp.gt.s32.totalorder %v1327_v16, %v1583_v13  ;;  %vm1066_vm15 = vcmask 1047559  }
 0x4b0   : > { %v2825_v62 = vsel %vm1662_vm3, 1.0, %v3235_v46  ;;  %v1599_v0 = vsel %vm1591_vm5, %v1327_v16, 4294967294  ;;  %v1623_v36 = vsel %vm1591_vm5, 1, %v3233_v44 }
 0x4b1   : > { %v1697_v58 = vperm.slane %v2825_v62, %v3489_v20  ;;  %v1607_v55 = vperm.slane %v1599_v0, 7  ;;  %v1631_v32 = vperm.slane %v1623_v36, 7  ;;  %v1809_v36 = vld [vmem:[%s630_s27 + $0x8] sm:$0xff] }
 0x4b2   : > { %1849 = vmatpush.msra.mxu3 %v1809_v36  ;;  %v3064_v36 = vld [vmem:[%s4310_s11 + $0x40] sm:$0xff] }
 0x4b3   : > { %vm1615_vm10 = vcmp.eq.s32.totalorder %v1599_v0, %v1607_v55  ;;  %vm3984_vm7 = vcmp.eq.s32.totalorder %v1631_v32, 1  ;;  %v1704_v5 = vsel %vm1064_vm0, %v1697_v58, %v1703_v41  ;;  %v1810_v58 = vld [vmem:[%s630_s27 + $0x10] sm:$0xff]  ;;  %v3042_v55 = vld [vmem:[%s4307_s8 + $0x38] sm:$0xff] }
 0x4b4   : > { %vm1647_vm2 = vmand %vm3984_vm7, %vm1615_vm10  ;;  %1869 = vmatpush.msrb.mxu0 %v1810_v58  ;;  %v3050_v32 = vld [vmem:[%s4307_s8 + $0x78] sm:$0xff]  ;;  %v2998_v58 = vld [vmem:[%s4310_s11 + $0x90] sm:$0xf] }
 0x4b5   : > { %vm1655_vm1 = vmxor %vm1647_vm2, %vm3234_vm13  ;;  %vm1664_vm2 = vcmp.eq.s32.totalorder %v3426_v30, %v3489_v20  ;;  %2054 = vmatpush.bf16.msrb.mxu3 %v3050_v32 }
 0x4b6   : > { %vm1663_vm6 = vmand %vm1591_vm5, %vm1655_vm1  ;;  %vm4370_vm1 = vcmask 1042434   ;;  %v2818_v41 = vsel %vm1664_vm2, 1.0, %v3235_v46  ;;  %vm2033_vm2 = vcmask 359424  }
 0x4b7   : > { %v2826_v44 = vsel %vm1663_vm6, 1.0, %v3235_v46  ;;  %vm4371_vm6 = vcmask 1043459  }
 0x4b8   : > { %v1698_v33 = vperm.slane %v2826_v44, %v3489_v20  ;;  %v2912_v44 = vld [vmem:[%s4307_s8 + $0x90] sm:$0xf] }
 0x4ba   : > { %v1705_v6 = vsel %vm1066_vm15, %v1698_v33, %v1704_v5  ;;  %v3049_v5 = vld [vmem:[%s4307_s8 + $0x70] sm:$0xff] }
 0x4bb   : > { %v1715_v61 = vpop.permute.xlu1 %1714  ;;  %v1707_v57 = vmax.f32 %v2818_v41, %v1705_v6  ;;  %v3053_v33 = vld [vmem:[%s4307_s8 + $0x90] sm:$0x30]  ;;  %2055 = vmatpush.bf16.msrb.mxu3 %v3049_v5  ;;  %v3040_v6 = vld [vmem:[%s4307_s8 + $0x28] sm:$0xff]  ;;  %v3060_v41 = vld [vmem:[%s4310_s11 + $0x20] sm:$0xff] }
 0x4bc   : > { %vm1716_vm3 = vcmp.ne.s32.totalorder %v1715_v61, 0  ;;  %v3048_v61 = vld [vmem:[%s4307_s8 + $0x68] sm:$0xff] }
 0x4bd   : > { %vm1717_vm12 = vmand %vm3872_vm11, %vm1716_vm3 }
 0x4be   : > { %vm1718_vm10 = vmand %vm3889_vm9, %vm1716_vm3  ;;  %v2827_v11 = vsel %vm1717_vm12, 1.0, %v3235_v46  ;;  %vm4368_vm12 = vnez %v4362_v63 }
 0x4bf   : > { %v2828_v52 = vsel %vm1718_vm10, 1.0, %v3235_v46  ;;  %vm1719_vm13 = vmand %vm3909_vm14, %vm1716_vm3  ;;  %vm4367_vm14 = vnez %v4360_v26  ;;  %vm4373_vm10 = vcmask 1045509   ;;  %2056 = vmatpush.bf16.msrb.mxu3 %v3048_v61  ;;  %v3073_v61 = vld [vmem:[%s4310_s11 + $0x88] sm:$0xff] }
 0x4c0   : > { %v3133_v48 = vpack.i.bf16 %v2828_v52, %v2827_v11  ;;  %vm1720_vm5 = vmand %vm3925_vm8, %vm1716_vm3  ;;  %v2829_v18 = vsel %vm1719_vm13, 1.0, %v3235_v46  ;;  %vm4374_vm13 = vcmask 64512   ;;  %v2913_v11 = vor.u32 %v3053_v33, %v2912_v44 }
 0x4c1   : > { %v2830_v9 = vsel %vm1720_vm5, 1.0, %v3235_v46  ;;  %vm1723_vm11 = vmand %vm3973_vm4, %vm1716_vm3  ;;  %vm2037_vm5 = vcmask 1045504  }
 0x4c2   : > { %3134 = vperm.xlu0 %3130, %v3133_v48   ;;  %v3138_v45 = vpack.i.bf16 %v2830_v9, %v2829_v18  ;;  %vm1724_vm9 = vmand %vm3984_vm7, %vm1716_vm3  ;;  %v2833_v47 = vsel %vm1723_vm11, 1.0, %v3235_v46  ;;  %vm4369_vm7 = vcmask 1041409   ;;  %v2039_v52 = vsel %vm2037_vm5, %v2913_v11, 0  ;;  %v3052_v48 = vld [vmem:[%s4307_s8 + $0x88] sm:$0xff]  ;;  %v3039_v18 = vld [vmem:[%s4307_s8 + $0x20] sm:$0xff] }
 0x4c3   : > { %v2834_v21 = vsel %vm1724_vm9, 1.0, %v3235_v46  ;;  %vm1721_vm8 = vmand %vm4367_vm14, %vm1716_vm3  ;;  %2072 = vmatpush.bf16.msra.mxu0 %v2039_v52  ;;  %v3047_v9 = vld [vmem:[%s4307_s8 + $0x60] sm:$0xff] }
 0x4c4   : > { %3139 = vperm.xlu2 %3129, %v3138_v45   ;;  %v3149_v24 = vpack.i.bf16 %v2834_v21, %v2833_v47  ;;  %vm1722_vm4 = vmand %vm4368_vm12, %vm1716_vm3  ;;  %v2831_v31 = vsel %vm1721_vm8, 1.0, %v3235_v46  ;;  %vm4372_vm3 = vcmask 1044484   ;;  %2057 = vmatpush.bf16.msrb.mxu3 %v3047_v9  ;;  %v3038_v47 = vld [vmem:[%s4307_s8 + $0x18] sm:$0xff]  ;;  %v1874_v9 = vpack.c.bf16 %v3411_v7, %v3411_v7 }
 0x4c5   : > { %v2832_v53 = vsel %vm1722_vm4, 1.0, %v3235_v46  ;;  %v1808_v46 = vld [vmem:[%s630_s27] sm:$0xff]  ;;  %v3046_v21 = vld [vmem:[%s4307_s8 + $0x58] sm:$0xff]  ;;  %vm4375_vm12 = vmmov %vm4374_vm13  ;;  %s643_s27 = scalar_lea.vmem %s4315_s16, %s3384_s22 }
 0x4c6   : > { %3150 = vperm.xlu1 %3148, %v3149_v24   ;;  %v3143_v56 = vpack.i.bf16 %v2832_v53, %v2831_v31  ;;  %1829 = vmatpush.msra.mxu2 %v1808_v46  ;;  %v3037_v31 = vld [vmem:[%s4307_s8 + $0x10] sm:$0xff]  ;;  %vm4376_vm4 = vmmov %vm4375_vm12  ;;  %v3056_v46 = vld [vmem:[%s4310_s11] sm:$0xff] }
 0x4c7   : > { %2073 = vmatpush.bf16.msra.mxu0 %v3052_v48  ;;  %v3045_v53 = vld [vmem:[%s4307_s8 + $0x50] sm:$0xff]  ;;  %v3072_v48 = vld [vmem:[%s4310_s11 + $0x80] sm:$0xff] }
 0x4c8   : > { %2041 = vmatpush.bf16.msrb.mxu2 %v3042_v55  ;;  %2058 = vmatpush.bf16.msrb.mxu3 %v3046_v21  ;;  %v3074_v55 = vld [vmem:[%s4310_s11 + $0x90] sm:$0x30] }
 0x4c9   : > { %v2999_v32 = vor.u32 %v3074_v55, %v2998_v58 }
 0x4ca   : > { %3144 = vperm.xlu0 %3130, %v3143_v56  }
 0x4cb   : > { %v2269_v44 = vsel %vm2037_vm5, %v2999_v32, 0  ;;  %vm4382_vm5 = vmmov %vm4376_vm4 }
 0x4cc   : > { %2042 = vmatpush.bf16.msrb.mxu2 %v3041_v39  ;;  %2059 = vmatpush.bf16.msrb.mxu3 %v3045_v53 }
 0x4d0   : > { %2043 = vmatpush.bf16.msrb.mxu2 %v3040_v6 }
 0x4d4   : > { %2044 = vmatpush.bf16.msrb.mxu2 %v3039_v18  ;;  %v3055_v18 = vld [vmem:[%s4309_s10 + $0x8] sm:$0xff] }
 0x4d8   : > { %2045 = vmatpush.bf16.msrb.mxu2 %v3038_v47 }
 0x4dc   : > { %2046 = vmatpush.bf16.msrb.mxu2 %v3037_v31 }
 0x51e   : > { %v3140_v14 = vpop.permute.xlu2 %3139 }
 0x51f   : > { %v3141_v40 = vunpack.i.l.bf16 %v3140_v14  ;;  %v3142_v1 = vunpack.i.h.bf16 %v3140_v14 }
 0x521   : > { %v1775_v8 = vperm.slane %v3141_v40, %v3489_v20  ;;  %v1776_v29 = vperm.slane %v3142_v1, %v3489_v20 }
 0x534   : > { %v3135_v25 = vpop.permute.xlu0 %3134 }
 0x535   : > { %v3137_v15 = vunpack.i.h.bf16 %v3135_v25  ;;  %v3136_v43 = vunpack.i.l.bf16 %v3135_v25 }
 0x537   : > { %v1774_v26 = vperm.slane %v3137_v15, %v3489_v20  ;;  %v1773_v35 = vperm.slane %v3136_v43, %v3489_v20  ;;  %v3036_v15 = vld [vmem:[%s4307_s8 + $0x8] sm:$0xff] }
 0x538   : > { %v3151_v3 = vpop.permute.xlu1 %3150  ;;  %v3044_v43 = vld [vmem:[%s4307_s8 + $0x48] sm:$0xff]  ;;  %2047 = vmatpush.bf16.msrb.mxu2 %v3036_v15 }
 0x539   : > { %v1781_v63 = vsel %vm4369_vm7, %v1774_v26, %v1773_v35  ;;  %v3152_v60 = vunpack.i.l.bf16 %v3151_v3  ;;  %v3153_v4 = vunpack.i.h.bf16 %v3151_v3  ;;  %2060 = vmatpush.bf16.msrb.mxu3 %v3044_v43  ;;  %v3035_v3 = vld [vmem:[%s4307_s8] sm:$0xff]  ;;  %vm4377_vm7 = vmmov %vm4376_vm4 }
 0x53a   : > { %v1782_v38 = vsel %vm4370_vm1, %v1775_v8, %v1781_v63  ;;  %v3043_v63 = vld [vmem:[%s4307_s8 + $0x40] sm:$0xff]  ;;  %vm4378_vm1 = vcmask 261120  }
 0x53b   : > { %v1783_v34 = vsel %vm4371_vm6, %v1776_v29, %v1782_v38  ;;  %v1779_v54 = vperm.slane %v3152_v60, %v3489_v20  ;;  %v1780_v22 = vperm.slane %v3153_v4, %v3489_v20  ;;  %v3063_v60 = vld [vmem:[%s4310_s11 + $0x38] sm:$0xff]  ;;  %v3070_v29 = vld [vmem:[%s4310_s11 + $0x70] sm:$0xff]  ;;  %v4128_v4 = vld [vmem:[%s3390_s30] sm:$0xff] }
 0x53c   : > { %v3145_v17 = vpop.permute.xlu0 %3144  ;;  %2048 = vmatpush.bf16.msrb.mxu2 %v3035_v3  ;;  %2344 = vrot.lane.b32.xlu2 %v4128_v4, %s3236_s23  ;;  %vm4379_vm6 = vmmov %vm4378_vm1  ;;  %s3240_s23 = smov 16  }
 0x53d   : > { %v3147_v50 = vunpack.i.h.bf16 %v3145_v17  ;;  %v3146_v19 = vunpack.i.l.bf16 %v3145_v17  ;;  %2061 = vmatpush.bf16.msrb.mxu3 %v3043_v63  ;;  %2449 = vrot.lane.b32.xlu1 %v4128_v4, %s3237_s29 }
 0x53f   : > { %v1778_v28 = vperm.slane %v3147_v50, %v3489_v20  ;;  %v1777_v42 = vperm.slane %v3146_v19, %v3489_v20  ;;  %v3071_v50 = vld [vmem:[%s4310_s11 + $0x78] sm:$0xff]  ;;  %v3062_v19 = vld [vmem:[%s4310_s11 + $0x30] sm:$0xff] }
 0x541   : > { %v1784_v30 = vsel %vm4372_vm3, %v1777_v42, %v1783_v34  ;;  %v3061_v42 = vld [vmem:[%s4310_s11 + $0x28] sm:$0xff]  ;;  %vm2346_vm3 = vcmask 130048  }
 0x542   : > { %v1785_v12 = vsel %vm4373_vm10, %v1778_v28, %v1784_v30  ;;  %v3051_v28 = vld [vmem:[%s4307_s8 + $0x80] sm:$0xff]  ;;  %v3069_v34 = vld [vmem:[%s4310_s11 + $0x68] sm:$0xff]  ;;  %v3059_v30 = vld [vmem:[%s4310_s11 + $0x18] sm:$0xff] }
 0x543   : > { %v1786_v16 = vsel %vm1064_vm0, %v1779_v54, %v1785_v12  ;;  %2074 = vmatpush.bf16.msra.mxu0 %v3051_v28  ;;  %v3068_v54 = vld [vmem:[%s4310_s11 + $0x60] sm:$0xff]  ;;  %v3034_v12 = vld [vmem:[%s4306_s7 + $0x8] sm:$0xff]  ;;  %vm4380_vm10 = vmmov %vm4376_vm4 }
 0x544   : > { %v1787_v13 = vsel %vm1066_vm15, %v1780_v22, %v1786_v16  ;;  %v3067_v22 = vld [vmem:[%s4310_s11 + $0x58] sm:$0xff]  ;;  %v3058_v16 = vld [vmem:[%s4310_s11 + $0x10] sm:$0xff] }
 0x545   : > { %v4045_v62 = vmax.f32 %v1707_v57, %v1787_v13  ;;  %v3033_v57 = vld [vmem:[%s4306_s7] sm:$0xff]  ;;  %v3066_v13 = vld [vmem:[%s4310_s11 + $0x50] sm:$0xff] }
 0x547   : > { %v1790_v0 = vsel %vm4374_vm13, %v4045_v62, 0.0  ;;  %vm4381_vm13 = vmmov %vm4376_vm4 }
 0x548   : > { %1791 = vadd.xlane.f32.xlu0 %v1790_v0  ;;  %v3065_v0 = vld [vmem:[%s4310_s11 + $0x48] sm:$0xff] }
 0x596   : > { %v2345_v47 = vpop.permute.xlu2 %2344 }
 0x5bb   : > { %v1792_v45 = vpop.xlane.xlu0 %1791 }
 0x5bc   : > { %3157 = vrcp.f32 %v1792_v45  ;;  %v1804_v25 = vand.u32 2147483648, %v1792_v45  ;;  %v1802_v26 = vand.u32 2147483647, %v1792_v45  ;;  %vm1798_vm9 = vweird.f32 %v1792_v45 }
 0x5be   : > { %v1805_v1 = vor.u32 1.1754944e-38, %v1804_v25  ;;  %vm1803_vm8 = vcmp.eq.f32.partialorder %v1802_v26, 8.507059e+37 }
 0x5c2   : > { %v3158_v24 = vpop.eup %3157 }
 0x5c3   : > { %v1794_v56 = vmul.f32 %v3158_v24, %v1792_v45  ;;  %vm1799_vm11 = vweird.f32 %v3158_v24  ;;  %v3054_v45 = vld [vmem:[%s4309_s10] sm:$0xff] }
 0x5c4   : > { %vm1800_vm14 = vmor %vm1798_vm9, %vm1799_vm11 }
 0x5c5   : > { %v1795_v14 = vsub.f32 1.0, %v1794_v56  ;;  %vm4383_vm11 = vmmov %vm4376_vm4 }
 0x5c7   : > { %v1796_v40 = vmul.f32 %v3158_v24, %v1795_v14  ;;  %v3155_v14 = vld [vmem:[%s4308_s9] ss:$0 sm:$0xff] }
 0x5c9   : > { %v1797_v35 = vadd.f32 %v3158_v24, %v1796_v40 }
 0x5cb   : > { %v1801_v8 = vsel %vm1800_vm14, %v3158_v24, %v1797_v35 }
 0x5cc   : > { %v1806_v17 = vsel %vm1803_vm8, %v1805_v1, %v1801_v8  ;;  %v2450_v1 = vpop.permute.xlu1 %2449 }
 0x5cd   : > { %v1807_v38 = vmul.f32 %v1806_v17, %v4045_v62  ;;  %v3057_v62 = vld [vmem:[%s4310_s11 + $0x8] sm:$0xff] }
 0x5cf   : > { %2835 = vmatmul.msk.f32.vlgmr.msra.gmra.mxu2 %vm4375_vm12, %v1807_v38  ;;  %2836 = vmatmul.msk.f32.vlgmr.msra.gmra.mxu3 %vm4376_vm4, %v1807_v38 }
 0x5d0   : > { %2837 = vmatmul.msk.f32.vlgmr.msrb.gmra.mxu0 %vm4377_vm7, %v1807_v38  ;;  %2271 = vmatpush.bf16.msra.mxu2 %v3063_v60 }
 0x5d1   : > { %2284 = vmatpush.bf16.msra.mxu3 %v3071_v50  ;;  %2101 = vmatpush.bf16.msrb.mxu0 %v3034_v12 }
 0x5d4   : > { %2272 = vmatpush.bf16.msra.mxu2 %v3062_v19 }
 0x5d5   : > { %2285 = vmatpush.bf16.msra.mxu3 %v3070_v29  ;;  %2102 = vmatpush.bf16.msrb.mxu0 %v3033_v57 }
 0x5d8   : > { %2273 = vmatpush.bf16.msra.mxu2 %v3061_v42 }
 0x5d9   : > { %2286 = vmatpush.bf16.msra.mxu3 %v3069_v34 }
 0x5dc   : > { %2274 = vmatpush.bf16.msra.mxu2 %v3060_v41 }
 0x5dd   : > { %2287 = vmatpush.bf16.msra.mxu3 %v3068_v54 }
 0x5e0   : > { %2275 = vmatpush.bf16.msra.mxu2 %v3059_v30 }
 0x5e1   : > { %2288 = vmatpush.bf16.msra.mxu3 %v3067_v22 }
 0x5e4   : > { %2276 = vmatpush.bf16.msra.mxu2 %v3058_v16 }
 0x5e5   : > { %2289 = vmatpush.bf16.msra.mxu3 %v3066_v13 }
 0x5e8   : > { %2277 = vmatpush.bf16.msra.mxu2 %v3057_v62 }
 0x5e9   : > { %2290 = vmatpush.bf16.msra.mxu3 %v3065_v0 }
 0x5ec   : > { %2278 = vmatpush.bf16.msra.mxu2 %v3056_v46 }
 0x5ed   : > { %2291 = vmatpush.bf16.msra.mxu3 %v3064_v36 }
 0x64d   : > { %v1871_v39 = vpop.f32.mrf.mxu0 }
 0x64e   : > { %v1877_v5 = vpack.c.bf16 %v1871_v39, %v1871_v39 }
 0x650   : > { %2914 = vmatmul.msk.bf16.vlgmr.msra.gmra.mxu0 %vm2033_vm2, %v1877_v5 }
 0x651   : > { %2302 = vmatpush.bf16.msra.mxu0 %v2269_v44 }
 0x652   : > { %v1831_v33 = vpop.f32.mrf.mxu2  ;;  %v1851_v6 = vpop.f32.mrf.mxu3 }
 0x653   : > { %v1875_v11 = vpack.c.bf16 %v1831_v33, %v1831_v33  ;;  %v1876_v52 = vpack.c.bf16 %v1851_v6, %v1851_v6 }
 0x655   : > { %2049 = vmatmul.bf16.vlgmr.msrb.gmra.mxu2 %v1875_v11  ;;  %2062 = vmatmul.bf16.vlgmr.msrb.gmra.mxu3 %v1876_v52 }
 0x656   : > { %2303 = vmatpush.bf16.msra.mxu0 %v3073_v61  ;;  %3010 = vmatpush.xpose.msk.msrb.mxu3 %vm2346_vm3, %v2345_v47 }
 0x65a   : > { %2304 = vmatpush.bf16.msra.mxu0 %v3072_v48 }
 0x660   : > { %2923 = vmatmul.msk.bf16.vlgmr.msrb.gmra.mxu0 %vm4378_vm1, %v1874_v9 }
 0x661   : > { %2328 = vmatpush.bf16.msrb.mxu0 %v3055_v18 }
 0x665   : > { %2279 = vmatmul.bf16.vlgmr.msra.gmra.mxu2 %v1875_v11  ;;  %2292 = vmatmul.bf16.vlgmr.msra.gmra.mxu3 %v1876_v52 }
 0x666   : > { %2329 = vmatpush.bf16.msrb.mxu0 %v3054_v45  ;;  %3018 = vmatpush.xpose.msk.msra.mxu3 %vm2346_vm3, %v2450_v1 }
 0x670   : > { %3000 = vmatmul.msk.bf16.vlgmr.msra.gmra.mxu0 %vm2033_vm2, %v1877_v5 }
 0x680   : > { %3009 = vmatmul.msk.bf16.vlgmr.msrb.gmra.mxu0 %vm4379_vm6, %v1874_v9 }
 0x6cd   : > { %v2076_v21 = vpop.f32.mrf.mxu0 }
 0x6d5   : > { %v2078_v7 = vpop.f32.mrf.mxu0 }
 0x6d8   : > { %v2050_v24 = vpop.f32.mrf.mxu2  ;;  %v2063_v31 = vpop.f32.mrf.mxu3 }
 0x6d9   : > { %v2064_v53 = vadd.f32 %v2063_v31, %v2050_v24 }
 0x6db   : > { %v2077_v56 = vadd.f32 %v2076_v21, %v2064_v53 }
 0x6dd   : > { %v2104_v25 = vpop.f32.mrf.mxu0 }
 0x6de   : > { %v2105_v15 = vadd.f32 %v2104_v25, %v2077_v56 }
 0x6e0   : > { %v2112_v43 = vadd.f32 %v3155_v14, %v2105_v15  ;;  %v2052_v40 = vpop.f32.mrf.mxu2  ;;  %v2065_v26 = vpop.f32.mrf.mxu3 }
 0x6e2   : > { %2447 = vrot.lane.b32.xlu2 %v2112_v43, %s3238_s19  ;;  %3011 = vmatmul.msk.f32.vlgmr.msrb.gmra.mxu3 %vm2346_vm3, %v2112_v43  ;;  %v3076_v43 = vld [vmem:[%s4311_s12 + $0x8] sm:$0xff]  ;;  %s599_s19 = sand.u32 1, %s3222_s25  }
 0x6e3   : > { %s2579_s2 = scalar_lea.sflag [#allocation3], %s599_s19 }
 0x6e5   : > { %v2106_v35 = vpop.f32.mrf.mxu0 }
 0x6e6   : > { %v3156_v35 = vld [vmem:[%s4312_s13] ss:$0 sm:$0xff] }
 0x6e8   : > { %v2280_v3 = vpop.f32.mrf.mxu2  ;;  %v2293_v63 = vpop.f32.mrf.mxu3 }
 0x6e9   : > { %v2294_v8 = vadd.f32 %v2293_v63, %v2280_v3 }
 0x6ed   : > { %v2306_v17 = vpop.f32.mrf.mxu0 }
 0x6ee   : > { %v2307_v60 = vadd.f32 %v2306_v17, %v2294_v8 }
 0x6f0   : > { %v2282_v38 = vpop.f32.mrf.mxu2  ;;  %v2295_v50 = vpop.f32.mrf.mxu3 }
 0x6f5   : > { %v2308_v19 = vpop.f32.mrf.mxu0 }
 0x6fd   : > { %v2331_v29 = vpop.f32.mrf.mxu0 }
 0x6fe   : > { %v4208_v28 = vadd.f32 %v2331_v29, %v2307_v60 }
 0x700   : > { %v2339_v1 = vadd.f32 %v3156_v35, %v4208_v28 }
 0x705   : > { %v2333_v42 = vpop.f32.mrf.mxu0 }
 0x73c   : > { %v2448_v34 = vpop.permute.xlu2 %2447 }
 0x73d   : > { %3019 = vmatmul.msk.f32.vlgmr.msra.gmra.mxu3 %vm2346_vm3, %v2448_v34 }
 0x765   : > { %v2369_v41 = vpop.f32.mrf.mxu3 }
 0x766   : > { %v2372_v54 = vmul.f32 0.25, %v2369_v41 }
 0x768   : > { %v2373_v30 = vsel %vm4380_vm10, %v2372_v54, -inf  ;;  %vm4384_vm10 = vmmov %vm4376_vm4 }
 0x769   : > { %2374 = vmax.xlane.f32.xlu1 %v2373_v30 }
 0x782   : > { %2397 = vrot.lane.b32.xlu1 %v4128_v4, %s3239_s20  ;;  %s3027_s20 = sshll.u32 %s3352_s28, 3 }
 0x783   : > { %s2600_s18 = scalar_lea.hbm %s4314_s15, %s3027_s20 }
 0x784   : > { %s2604_s0 = sshll.u32 %s2600_s18, 4  ;;  %s2605_s0 = int_to_ptr.hbm [resolvable:$true] %s2604_s0 }
 0x785   : > { %s3182_s24 = sshra.s32 %s2605_s0, 4  ;;  %s3183_s24 = int_to_ptr.hbm [resolvable:$true] %s3182_s24 }
 0x786   : > { %s3184_s30 = scalar_lea.hbm %s3183_s24, 8  ;;  %p3189_p0 = scmp.lt.s32.totalorder %s3183_s24, %s4314_s15 }
 0x787   : > { %p3185_p11 = scmp.ne.s32.totalorder %s3183_s24, %s3184_s30 }
 0x789   : > { %p3186_p12 = pnand %p3185_p11, %p3369_p5 }
 0x78a   : > { %1029 = vperm.xlu1 %3148, %v3554_v2  }
 0x78b   : > { %p3187_p13 = pneg %p3186_p12 }
 0x792   : > { %1035 = vperm.xlu1 %3148, %v3570_v23  }
 0x79a   : > { %1041 = vperm.xlu1 %3148, %v3586_v37  }
 0x7c0   : > { %v2472_v22 = vpop.f32.mrf.mxu3 }
 0x7c1   : > { %v2475_v12 = vmul.f32 0.25, %v2472_v22 }
 0x7c3   : > { %v2476_v57 = vsel %vm4381_vm13, %v2475_v12, -inf  ;;  %vm4385_vm13 = vcmask 31744  }
 0x7c4   : > { %2477 = vmax.xlane.f32.xlu2 %v2476_v57 }
 0x7dc   : > { %v2375_v16 = vpop.xlane.xlu1 %2374 }
 0x7dd   : > { %v2376_v13 = vsub.f32 %v2372_v54, %v2375_v16 }
 0x7df   : > { %v2377_v62 = vmul.f32 1.442695, %v2376_v13 }
 0x7e1   : > { %3159 = vpow2.f32 %v2377_v62 }
 0x7e7   : > { %v3160_v0 = vpop.eup %3159 }
 0x7e8   : > { %v2379_v46 = vsel %vm4382_vm5, %v3160_v0, 0.0  ;;  %vm4386_vm5 = vmmov %vm4385_vm13 }
 0x7e9   : > { %2380 = vadd.xlane.f32.xlu0 %v2379_v46 }
 0x7f4   : > { %v2398_v36 = vpop.permute.xlu1 %2397 }
 0x7f5   : > { %2418 = vmatpush.msrb.mxu1 %v2398_v36 }
 0x7f7   : > { %2543 = vmatpush.bf16.msra.mxu1 %v3076_v43 }
 0x7fc   : > { %v1030_v54 = vpop.permute.xlu1 %1029 }
 0x804   : > { %v1036_v16 = vpop.permute.xlu1 %1035 }
 0x837   : > { %v2478_v2 = vpop.xlane.xlu2 %2477 }
 0x838   : > { %v2479_v58 = vsub.f32 %v2475_v12, %v2478_v2  ;;  %v1042_v2 = vpop.permute.xlu1 %1041 }
 0x83a   : > { %v2480_v23 = vmul.f32 1.442695, %v2479_v58 }
 0x83c   : > { %3161 = vpow2.f32 %v2480_v23 }
 0x842   : > { %v3162_v37 = vpop.eup %3161 }
 0x843   : > { %v2482_v55 = vsel %vm4383_vm11, %v3162_v37, 0.0  ;;  %vm4387_vm11 = vmmov %vm4386_vm5 }
 0x844   : > { %2483 = vadd.xlane.f32.xlu0 %v2482_v55 }
 0x858   : > { %2500 = vrot.lane.b32.xlu0 %v4128_v4, %s3240_s23  ;;  %s2795_s23 = sshll.u32 %s599_s19, 3 }
 0x859   : > { %s601_s28 = scalar_lea.vmem [#allocation2], %s2795_s23  ;;  %s3188_s23 = scalar_lea.hbm %s4314_s15, 16 }
 0x85a   : > { %s2602_s26 = sshll.u32 %s601_s28, 4  ;;  %p3190_p1 = scmp.lt.s32.totalorder %s3188_s23, %s3184_s30  ;;  %s2603_s26 = int_to_ptr.vmem [resolvable:$true] %s2602_s26 }
 0x85c   : > { %v2381_v32 = vpop.xlane.xlu0 %2380  ;;  %p3191_p2 = por %p3190_p1, %p3189_p0 }
 0x85d   : > { %3163 = vrcp.f32 %v2381_v32  ;;  %v2393_v33 = vand.u32 2147483648, %v2381_v32  ;;  %v2391_v61 = vand.u32 2147483647, %v2381_v32  ;;  %vm2387_vm14 = vweird.f32 %v2381_v32 }
 0x85e   : > { %p3192_p3 = pnand %p3191_p2, %p3187_p13 }
 0x85f   : > { %v2394_v52 = vor.u32 1.1754944e-38, %v2393_v33  ;;  %vm2392_vm12 = vcmp.eq.f32.partialorder %v2391_v61, 8.507059e+37 }
 0x860   : > { %1026 = vperm.xlu0 %3130, %v3546_v59  }
 0x863   : > { %v3164_v39 = vpop.eup %3163 }
 0x864   : > { %v2383_v5 = vmul.f32 %v3164_v39, %v2381_v32  ;;  %vm2388_vm9 = vweird.f32 %v3164_v39 }
 0x865   : > { %vm2389_vm8 = vmor %vm2387_vm14, %vm2388_vm9  ;;  %vm4388_vm14 = vcmask 1041409  }
 0x866   : > { %v2384_v44 = vsub.f32 1.0, %v2383_v5 }
 0x868   : > { %v2385_v6 = vmul.f32 %v3164_v39, %v2384_v44  ;;  %1032 = vperm.xlu0 %3130, %v3562_v10   ;;  %v1052_v44 = vperm.slane %v1042_v2, %v3489_v20 }
 0x86a   : > { %v2386_v11 = vadd.f32 %v3164_v39, %v2385_v6 }
 0x86c   : > { %v2390_v48 = vsel %vm2389_vm8, %v3164_v39, %v2386_v11  ;;  %vm4389_vm8 = vcmask 1042434  }
 0x86d   : > { %v2395_v4 = vsel %vm2392_vm12, %v2394_v52, %v2390_v48  ;;  %vm4390_vm12 = vcmask 1043459  }
 0x86e   : > { %v2396_v18 = vmul.f32 %v3160_v0, %v2395_v4 }
 0x870   : > { %1038 = vperm.xlu0 %3130, %v3578_v27   ;;  %3012 = vmatmul.msk.f32.vlgmr.msrb.gmra.mxu1 %vm4376_vm4, %v2396_v18  ;;  %vm4391_vm4 = vcmask 1044484  }
 0x878   : > { %1044 = vperm.xlu0 %3130, %v3593_v49   ;;  %v3075_v49 = vld [vmem:[%s4311_s12] sm:$0xff] }
 0x879   : > { %2440 = vmatpush.bf16.msrb.mxu2 %v3075_v49 }
 0x8b7   : > { %v2484_v59 = vpop.xlane.xlu0 %2483 }
 0x8b8   : > { %3165 = vrcp.f32 %v2484_v59  ;;  %v2496_v10 = vand.u32 2147483648, %v2484_v59  ;;  %v2494_v7 = vand.u32 2147483647, %v2484_v59  ;;  %vm2490_vm2 = vweird.f32 %v2484_v59 }
 0x8ba   : > { %v2497_v31 = vor.u32 1.1754944e-38, %v2496_v10  ;;  %vm2495_vm6 = vcmp.eq.f32.partialorder %v2494_v7, 8.507059e+37 }
 0x8be   : > { %v3166_v9 = vpop.eup %3165 }
 0x8bf   : > { %v2486_v45 = vmul.f32 %v3166_v9, %v2484_v59  ;;  %vm2491_vm7 = vweird.f32 %v3166_v9 }
 0x8c0   : > { %vm2492_vm1 = vmor %vm2490_vm2, %vm2491_vm7  ;;  %vm4392_vm7 = vcmask 1045509  }
 0x8c1   : > { %v2487_v47 = vsub.f32 1.0, %v2486_v45  ;;  %vm4393_vm2 = vmmov %vm4384_vm10 }
 0x8c3   : > { %v2488_v21 = vmul.f32 %v3166_v9, %v2487_v47 }
 0x8c5   : > { %v2489_v24 = vadd.f32 %v3166_v9, %v2488_v21 }
 0x8c7   : > { %v2493_v53 = vsel %vm2492_vm1, %v3166_v9, %v2489_v24 }
 0x8c8   : > { %v2498_v27 = vsel %vm2495_vm6, %v2497_v31, %v2493_v53 }
 0x8c9   : > { %v2499_v56 = vmul.f32 %v3162_v37, %v2498_v27  ;;  %v1050_v37 = vperm.slane %v1036_v16, %v3489_v20 }
 0x8ca   : > { %v2501_v14 = vpop.permute.xlu0 %2500 }
 0x8cb   : > { %2521 = vmatpush.msra.mxu0 %v2501_v14 }
 0x8cc   : > { %3020 = vmatmul.msk.f32.vlgmr.msra.gmra.mxu0 %vm4384_vm10, %v2499_v56 }
 0x8d2   : > { %v1027_v41 = vpop.permute.xlu0 %1026 }
 0x8d3   : > { %v1047_v46 = vperm.slane %v1027_v41, %v3489_v20 }
 0x8da   : > { %v1033_v30 = vpop.permute.xlu0 %1032 }
 0x8db   : > { %v1049_v58 = vperm.slane %v1033_v30, %v3489_v20 }
 0x8e2   : > { %v1039_v13 = vpop.permute.xlu0 %1038 }
 0x8e3   : > { %v1051_v39 = vperm.slane %v1039_v13, %v3489_v20 }
 0x8ea   : > { %v1045_v55 = vpop.permute.xlu0 %1044 }
 0x8eb   : > { %v1053_v6 = vperm.slane %v1045_v55, %v3489_v20 }
 0x8ed   : > { %v2420_v25 = vpop.f32.mrf.mxu1 }
 0x8ee   : > { %v2423_v15 = vpack.c.bf16 %v2420_v25, %v2420_v25 }
 0x8f0   : > { %3017 = vmatmul.msk.bf16.vlgmr.msrb.gmra.mxu2 %vm2346_vm3, %v2423_v15 }
 0x949   : > { %v2523_v40 = vpop.f32.mrf.mxu0 }
 0x94a   : > { %v2526_v26 = vpack.c.bf16 %v2523_v40, %v2523_v40 }
 0x94c   : > { %3025 = vmatmul.msk.bf16.vlgmr.msra.gmra.mxu1 %vm2346_vm3, %v2526_v26 }
 0x973   : > { %v2442_v3 = vpop.f32.mrf.mxu2 }
 0x974   : > { %v2446_v63 = vadd.f32 %v2442_v3, %v2339_v1 }
 0x97b   : > { %v2444_v8 = vpop.f32.mrf.mxu2 }
 0x9c9   : > { %v2545_v17 = vpop.f32.mrf.mxu1 }
 0x9ca   : > { %v2549_v60 = vadd.f32 %v2545_v17, %v2446_v63 }
 0x9cc   : > { %2550 = vst.msk [vmem:[%s643_s27] sm:$0xff] %vm4385_vm13, %v2549_v60  ;;  %v2551_v38 = vsel %vm4386_vm5, %v2549_v60, -inf }
 0x9cd   : > { %2552 = vmax.xlane.f32.xlu2 %v2551_v38 }
 0x9d1   : > { %v2547_v50 = vpop.f32.mrf.mxu1 }
 0xa40   : > { %v2553_v19 = vpop.xlane.xlu2 %2552 }
 0xa41   : > { %vm2554_vm3 = vcmp.ge.f32.partialorder %v2549_v60, %v2553_v19 }
 0xa42   : > { %v2555_v29 = vsel %vm2554_vm3, %v3489_v20, 4 }
 0xa43   : > { %v2556_v28 = vsel %vm4387_vm11, %v2555_v29, 2147483647 }
 0xa44   : > { %v2558_v42 = vshra.s32 %v2556_v28, 16  ;;  %v2557_v22 = vand.u32 65535, %v2556_v28 }
 0xa46   : > { %v2560_v34 = vcvt.s32.f32 %v2558_v42  ;;  %v2559_v57 = vcvt.s32.f32 %v2557_v22 }
 0xa48   : > { %2561 = vmin.xlane.f32.xlu2 %v2560_v34 }
 0xa60   : > { %1023 = vperm.xlu2 %3129, %v3538_v51   ;;  %v1048_v51 = vperm.slane %v1030_v54, %v3489_v20 }
 0xabb   : > { %v2562_v12 = vpop.xlane.xlu2 %2561 }
 0xabc   : > { %vm2563_vm9 = vcmp.eq.f32.partialorder %v2560_v34, %v2562_v12 }
 0xabd   : > { %v2564_v62 = vsel %vm2563_vm9, %v2559_v57, inf }
 0xabe   : > { %2565 = vmin.xlane.f32.xlu2 %v2564_v62 }
 0xac3   : > { %v1024_v0 = vpop.permute.xlu2 %1023 }
 0xac4   : > { %v1046_v36 = vperm.slane %v1024_v0, %v3489_v20 }
 0xac6   : > { %v1055_v23 = vsel %vm4388_vm14, %v1047_v46, %v1046_v36 }
 0xac7   : > { %v1057_v32 = vsel %vm4389_vm8, %v1048_v51, %v1055_v23 }
 0xac8   : > { %v1059_v5 = vsel %vm4390_vm12, %v1049_v58, %v1057_v32 }
 0xac9   : > { %v1061_v33 = vsel %vm4391_vm4, %v1050_v37, %v1059_v5 }
 0xaca   : > { %v1063_v61 = vsel %vm4392_vm7, %v1051_v39, %v1061_v33 }
 0xacb   : > { %v1065_v11 = vsel %vm1064_vm0, %v1052_v44, %v1063_v61 }
 0xacc   : > { %v1067_v52 = vsel %vm1066_vm15, %v1053_v6, %v1065_v11 }
 0xacd   : > { %1068 = vst.msk [vmem:[%s601_s28] sm:$0xff] %vm4393_vm2, %v1067_v52 }
 0xace   : > { %3195 = shalt.err (!%p3192_p3)
}
 0xacf   : > { %3078 = dma.vmem_to_hbm [thread:$0]  (%p3369_p5), %s2603_s26, 128, %s2605_s0, %s2579_s2   ;;  %v2568_v20 = vcvt.f32.s32 %v2562_v12  ;;  %vm2571_vm0 = vcmask 7168  }
 0xad0   : > { %s647_s28 = scalar_lea.vmem %s4316_s17, %s3384_s22 }
 0xad1   : > { %v2569_v4 = vshll.u32 %v2568_v20, 16 }
 0xb31   : > { %v2566_v48 = vpop.xlane.xlu2 %2565 }
 0xb32   : > { %v2567_v18 = vcvt.f32.s32 %v2566_v48 }
 0xb34   : > { %v2570_v59 = vadd.s32 %v2569_v4, %v2567_v18 }
 0xb36   : > { %2572 = vst.msk [vmem:[%s647_s28] sm:$0xff] %vm2571_vm0, %v2570_v59 }
 0xb37 PF: > { %s4394_s24 = sld [smem:[#allocation7_spill]] }
 0xb38   : > { %s4395_s30 = sld [smem:[#allocation5_spill]] }
 0xb3d   : > { %p3084_p4 = scmp.ge.s32.totalorder %s4394_s24, 2 }
 0xb3e   : > { %s2630_s20 = sand.u32 1, %s4395_s30  }
 0xb3f   : > { %p3081_p7 = pnand %p3084_p4, %p3373_p6  ;;  %s2631_s1 = scalar_lea.sflag [#allocation3], %s2630_s20 }
 0xb41   : > { %p3082_p5 = pneg %p3081_p7 }
 0xb43   : > { %3213 = dma.done.wait (%p3082_p5), %s2631_s1, 128  }
 0xb44   : > { %3215 = vsyncadd (%p3082_p5), %s2631_s1, 4294967168  ;;  %s4397_s27 = sld [smem:[#allocation8_spill]]  ;;  %s4400_s24 = smov %s3222_s25 }
 0xb45   : > { %s4398_s26 = sld [smem:[#allocation6_spill]] }
 0xb46   : > { %s4399_s0 = sld [smem:[#allocation9_spill]] }
 0xb4a   : > { %p28_p8 = scmp.ge.s32.totalorder %s4397_s27, 4  }
 0xb4b   : > { %s4401_s25 = smov %s4398_s26 }
 0xb4c   : > { %s4402_s26 = smov %s4399_s0  ;;  %30 = sbr.rel (!%p28_p8) target bundleno = 7 (0x7), region = 159 }
 0xb51   :  { %2651 = vsyncpa [#allocation3], 1 }
 0xb52   :  { %2653 = vsyncpa [#allocation3 + $0x1], 1 }

</bundles_post_ra>
